<compile_context>
chip_gen: v6e
topology: v6e:2x2x1
jax: 0.10.0
libtpu: 0.0.40
codegen_flags: <defaults>
</compile_context>

<pallas_src>
import math
import functools

import jax
import jax.numpy as jnp
from jax.experimental import pallas as pl
from jax.experimental.pallas import tpu as pltpu


def _layernorm(x, gamma, beta, eps=1e-5):
    mean = jnp.mean(x, axis=-1, keepdims=True)
    var = jnp.mean((x - mean) ** 2, axis=-1, keepdims=True)
    return (x - mean) * jax.lax.rsqrt(var + eps) * gamma + beta


# ---------------------------------------------------------------------------
# Kernel
# ---------------------------------------------------------------------------
def transformer_encoder_kernel(
    x_ref,        # (S, E)      bf16  full sequence of this batch element
    wqkv_ref,     # (E, 3E)     bf16  fused [Wq | Wk | Wv]
    wo_ref,       # (H, hd, E)  bf16  output projection, head-major
    wf1_ref,      # (E, 4E)     bf16
    wf2_ref,      # (4E, E)     bf16
    pvec_ref,     # (1, 13E)    f32   packed small params (biases / LN gamma+beta)
    out_ref,      # (TQ, E)     f32
    q_sc, k_sc, v_sc,  # (H, S, hd) bf16 persistent per-batch-element caches
    *, heads: int, mask: bool,
):
    f32, bf16 = jnp.float32, jnp.bfloat16
    S, E = x_ref.shape
    TQ = out_ref.shape[0]
    hd = E // heads
    scale = 1.0 / math.sqrt(hd)

    # --- packed small-parameter slab offsets (all multiples of E=128 lanes) ---
    b_qkv = pvec_ref[:, 0:3 * E]           # (1, 3E)
    b_o   = pvec_ref[:, 3 * E:4 * E]
    g1    = pvec_ref[:, 4 * E:5 * E]
    be1   = pvec_ref[:, 5 * E:6 * E]
    b_f1  = pvec_ref[:, 6 * E:10 * E]
    b_f2  = pvec_ref[:, 10 * E:11 * E]
    g2    = pvec_ref[:, 11 * E:12 * E]
    be2   = pvec_ref[:, 12 * E:13 * E]

    # --- per-batch-element Q/K/V cache fill: runs ONCE (first q-tile) --------
    # One fused wide MXU matmul; the head-split relayout happens here once and
    # is amortised across every query tile of this batch element (review: no
    # K/V recompute per tile, fused (E,3E) QKV matmul, no per-tile head copies).
    @pl.when(pl.program_id(1) == 0)
    def _fill_qkv_cache():
        x_full = x_ref[...]                                           # (S, E) bf16
        qkv = jnp.dot(x_full, wqkv_ref[...], preferred_element_type=f32)
        qkv = qkv + b_qkv                                             # (S, 3E) f32
        for h in range(heads):   # static unroll; once per batch element
            q_sc[h] = (qkv[:, h * hd:(h + 1) * hd] * scale).astype(bf16)
            k_sc[h] = qkv[:, E + h * hd:E + (h + 1) * hd].astype(bf16)
            v_sc[h] = qkv[:, 2 * E + h * hd:2 * E + (h + 1) * hd].astype(bf16)

    i = pl.program_id(1)
    q_start = pl.multiple_of(i * TQ, TQ)

    # --- attention for this (TQ, E) query-row slab ---------------------------
    qh = q_sc[:, pl.ds(q_start, TQ), :]      # (H, TQ, hd) bf16, scale folded in
    kh = k_sc[...]                           # (H, S,  hd) bf16
    vh = v_sc[...]                           # (H, S,  hd) bf16

    s = jnp.einsum("hqd,hkd->hqk", qh, kh, preferred_element_type=f32)  # (H,TQ,S)

    if mask:
        # PyTorch apply_mask writes 0.0 (NOT -inf) into the strict upper
        # triangle of the scores before softmax — reproduce exactly.
        row = q_start + jax.lax.broadcasted_iota(jnp.int32, (TQ, S), 0)
        col = jax.lax.broadcasted_iota(jnp.int32, (TQ, S), 1)
        s = jnp.where((col > row)[None, :, :], 0.0, s)

    # softmax over keys (f32); normalise with the otherwise-idle EUP reciprocal
    s = s - jnp.max(s, axis=-1, keepdims=True)
    p = jnp.exp(s)
    p = p * pl.reciprocal(jnp.sum(p, axis=-1, keepdims=True), approx=True)

    o = jnp.einsum("hqk,hkd->hqd", p.astype(bf16), vh,
                   preferred_element_type=f32)                         # (H,TQ,hd)

    # Head concat fused into the output projection (Wo already head-major):
    # per-head (TQ,hd)x(hd,E) matmuls batched over H, then summed — no
    # transpose / lane-merge relayout per tile.
    attn = jnp.einsum("hqd,hde->hqe", o.astype(bf16), wo_ref[...],
                      preferred_element_type=f32).sum(axis=0) + b_o    # (TQ, E)

    # residual + LayerNorm1 (f32)
    x_tile = x_ref[pl.ds(q_start, TQ), :].astype(f32)
    x1 = _layernorm(x_tile + attn, g1, be1)

    # FFN: (TQ,E)x(E,4E) -> ReLU -> (TQ,4E)x(4E,E)
    h1 = jnp.dot(x1.astype(bf16), wf1_ref[...], preferred_element_type=f32) + b_f1
    h1 = jnp.maximum(h1, 0.0)
    h2 = jnp.dot(h1.astype(bf16), wf2_ref[...], preferred_element_type=f32) + b_f2

    # residual + LayerNorm2 (f32)
    out_ref[...] = _layernorm(x1 + h2, g2, be2)


# ---------------------------------------------------------------------------
# Generation-aware VMEM model / tiling plan
# ---------------------------------------------------------------------------
def _vmem_capacity_bytes():
    # v5e/v6e: 128 MiB per core, v7x: 64 MiB per core.
    try:
        info = pltpu.get_tpu_info()
        cap = getattr(info, "vmem_capacity_bytes", None)
        if cap:
            return int(min(cap, 128 * 1024 * 1024))
    except Exception:
        pass
    return 64 * 1024 * 1024  # conservative (v7x-sized) assumption


def _plan_tiles(B, S, E, heads):
    """Pick (q_tile, weight_buffers, x_buffers, vmem_limit_bytes)."""
    hd = E // heads
    hd_pad = ((hd + 127) // 128) * 128                    # lane padding of caches

    cap = _vmem_capacity_bytes()
    vmem_limit = max(min((cap * 7) // 8, 112 * 1024 * 1024), 32 * 1024 * 1024)
    budget = int(vmem_limit * 0.85)                       # headroom for temporaries

    w_copy = (3 * E * E + E * E + 4 * E * E + 4 * E * E) * 2   # bf16 weights, 1 copy
    pvec = 13 * E * 4
    x_blk = S * E * 2
    cache = 3 * heads * S * hd_pad * 2                         # head-major bf16 caches

    def fits(t, w_bufs, x_bufs):
        scores = heads * t * S * 4 * 2          # scores + exp temporaries (f32)
        attn_h = heads * t * E * 4              # per-head projected outputs
        ffn = t * 4 * E * 4                     # ReLU activations (f32)
        io = t * E * 4 * 2                      # double-buffered output block
        misc = t * E * 4 * 4                    # x tile / residuals / x1 / h2
        fixed = w_copy * w_bufs + pvec * 2 + x_blk * x_bufs + cache
        return fixed + scores + attn_h + ffn + io + misc <= budget

    # Only introduce the q-tile axis when VMEM forces it (TQ = S otherwise).
    cands = ([S] if S <= 256 else []) + [t for t in (256, 128, 64, 32, 16, 8)
                                         if t < S and S % t == 0]
    if not cands:
        cands = [S]

    for t in cands:                                   # prefer largest tile
        for w_bufs, x_bufs in ((2, 2), (1, 2), (1, 1)):   # least aggressive first
            if fits(t, w_bufs, x_bufs):
                return t, w_bufs, x_bufs, vmem_limit
    return cands[-1], 1, 1, vmem_limit


# ---------------------------------------------------------------------------
# Wrapper
# ---------------------------------------------------------------------------
def init_params(key, embedding_dim, heads):
    """Deterministic synthetic parameters (weights stored as (in, out))."""
    E = embedding_dim
    ks = jax.random.split(key, 8)

    def w(k, shape, scale=0.05):
        return jax.random.normal(k, shape, dtype=jnp.float32) * scale

    return dict(
        wq=w(ks[0], (E, E)), bq=w(ks[0], (E,)),
        wk=w(ks[1], (E, E)), bk=w(ks[1], (E,)),
        wv=w(ks[2], (E, E)), bv=w(ks[2], (E,)),
        wo=w(ks[3], (E, E)), bo=w(ks[3], (E,)),
        g1=jnp.ones((E,), jnp.float32), be1=jnp.zeros((E,), jnp.float32),
        wf1=w(ks[4], (E, 4 * E)), bf1=w(ks[5], (4 * E,)),
        wf2=w(ks[6], (4 * E, E)), bf2=w(ks[7], (E,)),
        g2=jnp.ones((E,), jnp.float32), be2=jnp.zeros((E,), jnp.float32),
    )


def transformer_encoder(x, params, *, heads, mask=False):
    B, S, E = x.shape
    assert E % heads == 0
    hd = E // heads

    TQ, w_bufs, x_bufs, vmem_limit = _plan_tiles(B, S, E, heads)
    n_q = S // TQ

    bf16 = jnp.bfloat16
    xb = x.astype(bf16)

    # Fused QKV weight, head-major Wo, packed small-parameter slab (all boundary
    # layout work is done once, in plain XLA, outside the kernel).
    wqkv = jnp.concatenate(
        [params["wq"], params["wk"], params["wv"]], axis=1).astype(bf16)     # (E, 3E)
    wo_h = params["wo"].reshape(heads, hd, E).astype(bf16)                   # (H, hd, E)
    wf1 = params["wf1"].astype(bf16)
    wf2 = params["wf2"].astype(bf16)
    pvec = jnp.concatenate([
        params["bq"], params["bk"], params["bv"],     # 3E
        params["bo"],                                 # E
        params["g1"], params["be1"],                  # 2E
        params["bf1"],                                # 4E
        params["bf2"],                                # E
        params["g2"], params["be2"],                  # 2E
    ]).astype(jnp.float32)[None, :]                   # (1, 13E)

    def wspec(shape, bufs):
        idx = lambda b, i: (0,) * len(shape)
        if bufs == 1:
            # Weights are identical for every grid step: single-buffer them only
            # when the VMEM model says double-buffering does not fit.
            return pl.BlockSpec(shape, idx, pipeline_mode=pl.Buffered(1))
        return pl.BlockSpec(shape, idx)

    if x_bufs == 1:
        x_spec = pl.BlockSpec((None, S, E), lambda b, i: (b, 0, 0),
                              pipeline_mode=pl.Buffered(1))
    else:
        x_spec = pl.BlockSpec((None, S, E), lambda b, i: (b, 0, 0))

    in_specs = [
        x_spec,                               # full sequence (re-DMAed only when b changes)
        wspec((E, 3 * E), w_bufs),
        wspec((heads, hd, E), w_bufs),
        wspec((E, 4 * E), w_bufs),
        wspec((4 * E, E), w_bufs),
        wspec((1, 13 * E), w_bufs),
    ]
    out_spec = pl.BlockSpec((None, TQ, E), lambda b, i: (b, i, 0))

    kernel = functools.partial(transformer_encoder_kernel, heads=heads, mask=mask)

    fn = pl.pallas_call(
        kernel,
        out_shape=jax.ShapeDtypeStruct((B, S, E), jnp.float32),
        grid=(B, n_q),
        in_specs=in_specs,
        out_specs=out_spec,
        scratch_shapes=[
            pltpu.VMEM((heads, S, hd), bf16),   # Q cache (scaled)
            pltpu.VMEM((heads, S, hd), bf16),   # K cache
            pltpu.VMEM((heads, S, hd), bf16),   # V cache
        ],
        compiler_params=pltpu.CompilerParams(
            # q-tile axis carries the K/V cache -> "arbitrary"; batch is parallel.
            dimension_semantics=("parallel", "arbitrary"),
            vmem_limit_bytes=int(vmem_limit),
        ),
    )
    return fn(xb, wqkv, wo_h, wf1, wf2, pvec)


# ---------------------------------------------------------------------------
# Pure-JAX reference with the same bf16-matmul / f32-accumulate precision
# ---------------------------------------------------------------------------
def reference_forward(x, params, *, heads, mask=False):
    B, S, E = x.shape
    hd = E // heads
    scale = 1.0 / math.sqrt(hd)
    f32 = jnp.float32
    bf = lambda a: a.astype(jnp.bfloat16)
    xb = bf(x)

    def mm(a, w):
        return jnp.einsum("bse,ef->bsf", bf(a), bf(w), preferred_element_type=f32)

    Q = mm(xb, params["wq"]) + params["bq"]
    K = mm(xb, params["wk"]) + params["bk"]
    V = mm(xb, params["wv"]) + params["bv"]

    Qh = bf(Q * scale).reshape(B, S, heads, hd).transpose(0, 2, 1, 3)
    Kh = bf(K).reshape(B, S, heads, hd).transpose(0, 2, 1, 3)
    Vh = bf(V).reshape(B, S, heads, hd).transpose(0, 2, 1, 3)

    s = jnp.einsum("bhqd,bhkd->bhqk", Qh, Kh, preferred_element_type=f32)
    if mask:
        row = jnp.arange(S)[:, None]
        col = jnp.arange(S)[None, :]
        s = jnp.where(col > row, 0.0, s)          # zero-fill, per apply_mask
    p = jax.nn.softmax(s, axis=-1)
    o = jnp.einsum("bhqk,bhkd->bhqd", bf(p), Vh, preferred_element_type=f32)
    o = o.transpose(0, 2, 1, 3).reshape(B, S, E)

    attn = mm(o, params["wo"]) + params["bo"]
    x1 = _layernorm(xb.astype(f32) + attn, params["g1"], params["be1"])
    h1 = jnp.maximum(mm(x1, params["wf1"]) + params["bf1"], 0.0)
    h2 = mm(h1, params["wf2"]) + params["bf2"]
    return _layernorm(x1 + h2, params["g2"], params["be2"])


if __name__ == "__main__":
    # E a multiple of 128 (lane-dense blocks / unmasked stores), S a multiple of 8.
    B, S, E, HEADS = 2, 8, 128, 4
    key = jax.random.PRNGKey(0)
    kx, kp = jax.random.split(key)
    x = jax.random.normal(kx, (B, S, E), dtype=jnp.float32)
    params = init_params(kp, E, HEADS)

    for use_mask in (False, True):
        out = jax.block_until_ready(
            transformer_encoder(x, params, heads=HEADS, mask=use_mask))
        ref = reference_forward(x, params, heads=HEADS, mask=use_mask)
        assert out.shape == (B, S, E)
        max_err = float(jnp.max(jnp.abs(out - ref)))
        assert jnp.allclose(out, ref, atol=2e-2, rtol=2e-2), (
            f"mismatch vs reference (mask={use_mask}, max_err={max_err})")

    print("KERNEL_OK")
</pallas_src>

<mosaic_0001>
module attributes {stable_mosaic.version = 11 : i64} {
  func.func @transformer_encoder_kernel(%arg0: i32, %arg1: i32, %arg2: memref<1x8x128xbf16, #tpu.memory_space<vmem>>, %arg3: memref<128x384xbf16, #tpu.memory_space<vmem>>, %arg4: memref<4x32x128xbf16, #tpu.memory_space<vmem>>, %arg5: memref<128x512xbf16, #tpu.memory_space<vmem>>, %arg6: memref<512x128xbf16, #tpu.memory_space<vmem>>, %arg7: memref<1x1664xf32, #tpu.memory_space<vmem>>, %arg8: memref<1x8x128xf32, #tpu.memory_space<vmem>>, %arg9: memref<4x8x32xbf16, #tpu.memory_space<vmem>>, %arg10: memref<4x8x32xbf16, #tpu.memory_space<vmem>>, %arg11: memref<4x8x32xbf16, #tpu.memory_space<vmem>>) attributes {dimension_semantics = [#tpu.dimension_semantics<parallel>, #tpu.dimension_semantics<arbitrary>], iteration_bounds = array<i64: 2, 1>, scalar_prefetch = 0 : i64, scratch_operands = 3 : i64, tpu.core_type = #tpu.core_type<tc>, window_params = [{transform_indices = @transform_0, window_bounds = array<i64: 1, 8, 128>}, {pipeline_mode = #tpu.pipeline_mode<synchronous>, transform_indices = @transform_1, window_bounds = array<i64: 128, 384>}, {pipeline_mode = #tpu.pipeline_mode<synchronous>, transform_indices = @transform_2, window_bounds = array<i64: 4, 32, 128>}, {pipeline_mode = #tpu.pipeline_mode<synchronous>, transform_indices = @transform_3, window_bounds = array<i64: 128, 512>}, {pipeline_mode = #tpu.pipeline_mode<synchronous>, transform_indices = @transform_4, window_bounds = array<i64: 512, 128>}, {pipeline_mode = #tpu.pipeline_mode<synchronous>, transform_indices = @transform_5, window_bounds = array<i64: 1, 1664>}, {transform_indices = @transform_6, window_bounds = array<i64: 1, 8, 128>}]} {
    %c0 = arith.constant 0 : index
    %c0_0 = arith.constant 0 : index
    %0 = vector.load %arg7[%c0, %c0_0] : memref<1x1664xf32, #tpu.memory_space<vmem>>, vector<1x384xf32>
    %c0_1 = arith.constant 0 : index
    %c384 = arith.constant 384 : index
    %1 = vector.load %arg7[%c0_1, %c384] : memref<1x1664xf32, #tpu.memory_space<vmem>>, vector<1x128xf32>
    %c0_2 = arith.constant 0 : index
    %c512 = arith.constant 512 : index
    %2 = vector.load %arg7[%c0_2, %c512] : memref<1x1664xf32, #tpu.memory_space<vmem>>, vector<1x128xf32>
    %c0_3 = arith.constant 0 : index
    %c640 = arith.constant 640 : index
    %3 = vector.load %arg7[%c0_3, %c640] : memref<1x1664xf32, #tpu.memory_space<vmem>>, vector<1x128xf32>
    %c0_4 = arith.constant 0 : index
    %c768 = arith.constant 768 : index
    %4 = vector.load %arg7[%c0_4, %c768] : memref<1x1664xf32, #tpu.memory_space<vmem>>, vector<1x512xf32>
    %c0_5 = arith.constant 0 : index
    %c1280 = arith.constant 1280 : index
    %5 = vector.load %arg7[%c0_5, %c1280] : memref<1x1664xf32, #tpu.memory_space<vmem>>, vector<1x128xf32>
    %c0_6 = arith.constant 0 : index
    %c1408 = arith.constant 1408 : index
    %6 = vector.load %arg7[%c0_6, %c1408] : memref<1x1664xf32, #tpu.memory_space<vmem>>, vector<1x128xf32>
    %c0_7 = arith.constant 0 : index
    %c1536 = arith.constant 1536 : index
    %7 = vector.load %arg7[%c0_7, %c1536] : memref<1x1664xf32, #tpu.memory_space<vmem>>, vector<1x128xf32>
    %c0_i32 = arith.constant 0 : i32
    %8 = arith.cmpi eq, %arg1, %c0_i32 : i32
    %9 = arith.extui %8 : i1 to i32
    %c0_i32_8 = arith.constant 0 : i32
    %10 = arith.cmpi ne, %9, %c0_i32_8 : i32
    scf.if %10 {
      %c0_47 = arith.constant 0 : index
      %c0_48 = arith.constant 0 : index
      %c0_49 = arith.constant 0 : index
      %101 = vector.load %arg2[%c0_47, %c0_48, %c0_49] : memref<1x8x128xbf16, #tpu.memory_space<vmem>>, vector<1x8x128xbf16>
      %102 = vector.shape_cast %101 : vector<1x8x128xbf16> to vector<8x128xbf16>
      %c0_50 = arith.constant 0 : index
      %c0_51 = arith.constant 0 : index
      %103 = vector.load %arg3[%c0_50, %c0_51] : memref<128x384xbf16, #tpu.memory_space<vmem>>, vector<128x384xbf16>
      %cst_52 = arith.constant dense<0.000000e+00> : vector<8x384xf32>
      %104 = tpu.matmul %102, %103, %cst_52 {dimension_numbers = #tpu.dot_dimension_numbers<[1], [0], [0], [1], [0, 0, 1, 1], [], []>} : vector<8x128xbf16>, vector<128x384xbf16>, vector<8x384xf32> -> vector<8x384xf32>
      %105 = vector.broadcast %0 : vector<1x384xf32> to vector<8x384xf32>
      %106 = arith.addf %104, %105 : vector<8x384xf32>
      %107 = vector.extract_strided_slice %106 {offsets = [0, 0], sizes = [8, 32], strides = [1, 1]} : vector<8x384xf32> to vector<8x32xf32>
      %cst_53 = arith.constant 0.176776692 : f32
      %108 = vector.broadcast %cst_53 : f32 to vector<8x32xf32>
      %109 = arith.mulf %107, %108 : vector<8x32xf32>
      %110 = arith.truncf %109 : vector<8x32xf32> to vector<8x32xbf16>
      %c0_54 = arith.constant 0 : index
      %c0_55 = arith.constant 0 : index
      %c0_56 = arith.constant 0 : index
      %111 = vector.load %arg9[%c0_54, %c0_55, %c0_56] : memref<4x8x32xbf16, #tpu.memory_space<vmem>>, vector<1x8x32xbf16>
      %112 = vector.shape_cast %111 : vector<1x8x32xbf16> to vector<8x32xbf16>
      %113 = vector.shape_cast %110 : vector<8x32xbf16> to vector<1x8x32xbf16>
      tpu.vector_store %arg9[%c0_54, %c0_55, %c0_56], %113 {strides = array<i32>} : memref<4x8x32xbf16, #tpu.memory_space<vmem>>, vector<1x8x32xbf16>,
      %114 = vector.extract_strided_slice %106 {offsets = [0, 128], sizes = [8, 32], strides = [1, 1]} : vector<8x384xf32> to vector<8x32xf32>
      %115 = arith.truncf %114 : vector<8x32xf32> to vector<8x32xbf16>
      %c0_57 = arith.constant 0 : index
      %c0_58 = arith.constant 0 : index
      %c0_59 = arith.constant 0 : index
      %116 = vector.load %arg10[%c0_57, %c0_58, %c0_59] : memref<4x8x32xbf16, #tpu.memory_space<vmem>>, vector<1x8x32xbf16>
      %117 = vector.shape_cast %116 : vector<1x8x32xbf16> to vector<8x32xbf16>
      %118 = vector.shape_cast %115 : vector<8x32xbf16> to vector<1x8x32xbf16>
      tpu.vector_store %arg10[%c0_57, %c0_58, %c0_59], %118 {strides = array<i32>} : memref<4x8x32xbf16, #tpu.memory_space<vmem>>, vector<1x8x32xbf16>,
      %119 = vector.extract_strided_slice %106 {offsets = [0, 256], sizes = [8, 32], strides = [1, 1]} : vector<8x384xf32> to vector<8x32xf32>
      %120 = arith.truncf %119 : vector<8x32xf32> to vector<8x32xbf16>
      %c0_60 = arith.constant 0 : index
      %c0_61 = arith.constant 0 : index
      %c0_62 = arith.constant 0 : index
      %121 = vector.load %arg11[%c0_60, %c0_61, %c0_62] : memref<4x8x32xbf16, #tpu.memory_space<vmem>>, vector<1x8x32xbf16>
      %122 = vector.shape_cast %121 : vector<1x8x32xbf16> to vector<8x32xbf16>
      %123 = vector.shape_cast %120 : vector<8x32xbf16> to vector<1x8x32xbf16>
      tpu.vector_store %arg11[%c0_60, %c0_61, %c0_62], %123 {strides = array<i32>} : memref<4x8x32xbf16, #tpu.memory_space<vmem>>, vector<1x8x32xbf16>,
      %124 = vector.extract_strided_slice %106 {offsets = [0, 32], sizes = [8, 32], strides = [1, 1]} : vector<8x384xf32> to vector<8x32xf32>
      %cst_63 = arith.constant 0.176776692 : f32
      %125 = vector.broadcast %cst_63 : f32 to vector<8x32xf32>
      %126 = arith.mulf %124, %125 : vector<8x32xf32>
      %127 = arith.truncf %126 : vector<8x32xf32> to vector<8x32xbf16>
      %c1 = arith.constant 1 : index
      %c0_64 = arith.constant 0 : index
      %c0_65 = arith.constant 0 : index
      %128 = vector.load %arg9[%c1, %c0_64, %c0_65] : memref<4x8x32xbf16, #tpu.memory_space<vmem>>, vector<1x8x32xbf16>
      %129 = vector.shape_cast %128 : vector<1x8x32xbf16> to vector<8x32xbf16>
      %130 = vector.shape_cast %127 : vector<8x32xbf16> to vector<1x8x32xbf16>
      tpu.vector_store %arg9[%c1, %c0_64, %c0_65], %130 {strides = array<i32>} : memref<4x8x32xbf16, #tpu.memory_space<vmem>>, vector<1x8x32xbf16>,
      %131 = vector.extract_strided_slice %106 {offsets = [0, 160], sizes = [8, 32], strides = [1, 1]} : vector<8x384xf32> to vector<8x32xf32>
      %132 = arith.truncf %131 : vector<8x32xf32> to vector<8x32xbf16>
      %c1_66 = arith.constant 1 : index
      %c0_67 = arith.constant 0 : index
      %c0_68 = arith.constant 0 : index
      %133 = vector.load %arg10[%c1_66, %c0_67, %c0_68] : memref<4x8x32xbf16, #tpu.memory_space<vmem>>, vector<1x8x32xbf16>
      %134 = vector.shape_cast %133 : vector<1x8x32xbf16> to vector<8x32xbf16>
      %135 = vector.shape_cast %132 : vector<8x32xbf16> to vector<1x8x32xbf16>
      tpu.vector_store %arg10[%c1_66, %c0_67, %c0_68], %135 {strides = array<i32>} : memref<4x8x32xbf16, #tpu.memory_space<vmem>>, vector<1x8x32xbf16>,
      %136 = vector.extract_strided_slice %106 {offsets = [0, 288], sizes = [8, 32], strides = [1, 1]} : vector<8x384xf32> to vector<8x32xf32>
      %137 = arith.truncf %136 : vector<8x32xf32> to vector<8x32xbf16>
      %c1_69 = arith.constant 1 : index
      %c0_70 = arith.constant 0 : index
      %c0_71 = arith.constant 0 : index
      %138 = vector.load %arg11[%c1_69, %c0_70, %c0_71] : memref<4x8x32xbf16, #tpu.memory_space<vmem>>, vector<1x8x32xbf16>
      %139 = vector.shape_cast %138 : vector<1x8x32xbf16> to vector<8x32xbf16>
      %140 = vector.shape_cast %137 : vector<8x32xbf16> to vector<1x8x32xbf16>
      tpu.vector_store %arg11[%c1_69, %c0_70, %c0_71], %140 {strides = array<i32>} : memref<4x8x32xbf16, #tpu.memory_space<vmem>>, vector<1x8x32xbf16>,
      %141 = vector.extract_strided_slice %106 {offsets = [0, 64], sizes = [8, 32], strides = [1, 1]} : vector<8x384xf32> to vector<8x32xf32>
      %cst_72 = arith.constant 0.176776692 : f32
      %142 = vector.broadcast %cst_72 : f32 to vector<8x32xf32>
      %143 = arith.mulf %141, %142 : vector<8x32xf32>
      %144 = arith.truncf %143 : vector<8x32xf32> to vector<8x32xbf16>
      %c2 = arith.constant 2 : index
      %c0_73 = arith.constant 0 : index
      %c0_74 = arith.constant 0 : index
      %145 = vector.load %arg9[%c2, %c0_73, %c0_74] : memref<4x8x32xbf16, #tpu.memory_space<vmem>>, vector<1x8x32xbf16>
      %146 = vector.shape_cast %145 : vector<1x8x32xbf16> to vector<8x32xbf16>
      %147 = vector.shape_cast %144 : vector<8x32xbf16> to vector<1x8x32xbf16>
      tpu.vector_store %arg9[%c2, %c0_73, %c0_74], %147 {strides = array<i32>} : memref<4x8x32xbf16, #tpu.memory_space<vmem>>, vector<1x8x32xbf16>,
      %148 = vector.extract_strided_slice %106 {offsets = [0, 192], sizes = [8, 32], strides = [1, 1]} : vector<8x384xf32> to vector<8x32xf32>
      %149 = arith.truncf %148 : vector<8x32xf32> to vector<8x32xbf16>
      %c2_75 = arith.constant 2 : index
      %c0_76 = arith.constant 0 : index
      %c0_77 = arith.constant 0 : index
      %150 = vector.load %arg10[%c2_75, %c0_76, %c0_77] : memref<4x8x32xbf16, #tpu.memory_space<vmem>>, vector<1x8x32xbf16>
      %151 = vector.shape_cast %150 : vector<1x8x32xbf16> to vector<8x32xbf16>
      %152 = vector.shape_cast %149 : vector<8x32xbf16> to vector<1x8x32xbf16>
      tpu.vector_store %arg10[%c2_75, %c0_76, %c0_77], %152 {strides = array<i32>} : memref<4x8x32xbf16, #tpu.memory_space<vmem>>, vector<1x8x32xbf16>,
      %153 = vector.extract_strided_slice %106 {offsets = [0, 320], sizes = [8, 32], strides = [1, 1]} : vector<8x384xf32> to vector<8x32xf32>
      %154 = arith.truncf %153 : vector<8x32xf32> to vector<8x32xbf16>
      %c2_78 = arith.constant 2 : index
      %c0_79 = arith.constant 0 : index
      %c0_80 = arith.constant 0 : index
      %155 = vector.load %arg11[%c2_78, %c0_79, %c0_80] : memref<4x8x32xbf16, #tpu.memory_space<vmem>>, vector<1x8x32xbf16>
      %156 = vector.shape_cast %155 : vector<1x8x32xbf16> to vector<8x32xbf16>
      %157 = vector.shape_cast %154 : vector<8x32xbf16> to vector<1x8x32xbf16>
      tpu.vector_store %arg11[%c2_78, %c0_79, %c0_80], %157 {strides = array<i32>} : memref<4x8x32xbf16, #tpu.memory_space<vmem>>, vector<1x8x32xbf16>,
      %158 = vector.extract_strided_slice %106 {offsets = [0, 96], sizes = [8, 32], strides = [1, 1]} : vector<8x384xf32> to vector<8x32xf32>
      %cst_81 = arith.constant 0.176776692 : f32
      %159 = vector.broadcast %cst_81 : f32 to vector<8x32xf32>
      %160 = arith.mulf %158, %159 : vector<8x32xf32>
      %161 = arith.truncf %160 : vector<8x32xf32> to vector<8x32xbf16>
      %c3 = arith.constant 3 : index
      %c0_82 = arith.constant 0 : index
      %c0_83 = arith.constant 0 : index
      %162 = vector.load %arg9[%c3, %c0_82, %c0_83] : memref<4x8x32xbf16, #tpu.memory_space<vmem>>, vector<1x8x32xbf16>
      %163 = vector.shape_cast %162 : vector<1x8x32xbf16> to vector<8x32xbf16>
      %164 = vector.shape_cast %161 : vector<8x32xbf16> to vector<1x8x32xbf16>
      tpu.vector_store %arg9[%c3, %c0_82, %c0_83], %164 {strides = array<i32>} : memref<4x8x32xbf16, #tpu.memory_space<vmem>>, vector<1x8x32xbf16>,
      %165 = vector.extract_strided_slice %106 {offsets = [0, 224], sizes = [8, 32], strides = [1, 1]} : vector<8x384xf32> to vector<8x32xf32>
      %166 = arith.truncf %165 : vector<8x32xf32> to vector<8x32xbf16>
      %c3_84 = arith.constant 3 : index
      %c0_85 = arith.constant 0 : index
      %c0_86 = arith.constant 0 : index
      %167 = vector.load %arg10[%c3_84, %c0_85, %c0_86] : memref<4x8x32xbf16, #tpu.memory_space<vmem>>, vector<1x8x32xbf16>
      %168 = vector.shape_cast %167 : vector<1x8x32xbf16> to vector<8x32xbf16>
      %169 = vector.shape_cast %166 : vector<8x32xbf16> to vector<1x8x32xbf16>
      tpu.vector_store %arg10[%c3_84, %c0_85, %c0_86], %169 {strides = array<i32>} : memref<4x8x32xbf16, #tpu.memory_space<vmem>>, vector<1x8x32xbf16>,
      %170 = vector.extract_strided_slice %106 {offsets = [0, 352], sizes = [8, 32], strides = [1, 1]} : vector<8x384xf32> to vector<8x32xf32>
      %171 = arith.truncf %170 : vector<8x32xf32> to vector<8x32xbf16>
      %c3_87 = arith.constant 3 : index
      %c0_88 = arith.constant 0 : index
      %c0_89 = arith.constant 0 : index
      %172 = vector.load %arg11[%c3_87, %c0_88, %c0_89] : memref<4x8x32xbf16, #tpu.memory_space<vmem>>, vector<1x8x32xbf16>
      %173 = vector.shape_cast %172 : vector<1x8x32xbf16> to vector<8x32xbf16>
      %174 = vector.shape_cast %171 : vector<8x32xbf16> to vector<1x8x32xbf16>
      tpu.vector_store %arg11[%c3_87, %c0_88, %c0_89], %174 {strides = array<i32>} : memref<4x8x32xbf16, #tpu.memory_space<vmem>>, vector<1x8x32xbf16>,
    } else {
    }
    %c8_i32 = arith.constant 8 : i32
    %11 = arith.muli %arg1, %c8_i32 : i32
    %12 = tpu.assume_multiple %11, 8 : i32
    %c0_9 = arith.constant 0 : index
    %13 = arith.index_cast %12 : i32 to index
    %c0_10 = arith.constant 0 : index
    %14 = vector.load %arg9[%c0_9, %13, %c0_10] : memref<4x8x32xbf16, #tpu.memory_space<vmem>>, vector<4x8x32xbf16>
    %c0_11 = arith.constant 0 : index
    %c0_12 = arith.constant 0 : index
    %c0_13 = arith.constant 0 : index
    %15 = vector.load %arg10[%c0_11, %c0_12, %c0_13] : memref<4x8x32xbf16, #tpu.memory_space<vmem>>, vector<4x8x32xbf16>
    %c0_14 = arith.constant 0 : index
    %c0_15 = arith.constant 0 : index
    %c0_16 = arith.constant 0 : index
    %16 = vector.load %arg11[%c0_14, %c0_15, %c0_16] : memref<4x8x32xbf16, #tpu.memory_space<vmem>>, vector<4x8x32xbf16>
    "tpu.trace_start"() <{level = 10 : i32, message = "hqd,hkd->hqk"}> : () -> ()
    %cst = arith.constant dense<0.000000e+00> : vector<4x8x8xf32>
    %17 = tpu.matmul %14, %15, %cst {dimension_numbers = #tpu.dot_dimension_numbers<[2], [2], [1], [1], [0, 0, 0, 1, 1, 1], [0], [0]>} : vector<4x8x32xbf16>, vector<4x8x32xbf16>, vector<4x8x8xf32> -> vector<4x8x8xf32>
    "tpu.trace_stop"() : () -> ()
    %cst_17 = arith.constant dense<0xFF800000> : vector<4x8xf32>
    %18 = vector.multi_reduction <maximumf>, %17, %cst_17 [2] : vector<4x8x8xf32> to vector<4x8xf32>
    %19 = vector.shape_cast %18 : vector<4x8xf32> to vector<4x8x1xf32>
    %20 = vector.broadcast %19 : vector<4x8x1xf32> to vector<4x8x8xf32>
    %21 = arith.subf %17, %20 : vector<4x8x8xf32>
    %22 = math.exp %21 : vector<4x8x8xf32>
    %cst_18 = arith.constant dense<0.000000e+00> : vector<4x8xf32>
    %23 = vector.multi_reduction <add>, %22, %cst_18 [2] : vector<4x8x8xf32> to vector<4x8xf32>
    %24 = vector.shape_cast %23 : vector<4x8xf32> to vector<4x8x1xf32>
    %25 = tpu.reciprocal %24 {approx = true} : vector<4x8x1xf32> -> vector<4x8x1xf32>
    %26 = vector.broadcast %25 : vector<4x8x1xf32> to vector<4x8x8xf32>
    %27 = arith.mulf %22, %26 : vector<4x8x8xf32>
    %28 = arith.truncf %27 : vector<4x8x8xf32> to vector<4x8x8xbf16>
    "tpu.trace_start"() <{level = 10 : i32, message = "hqk,hkd->hqd"}> : () -> ()
    %cst_19 = arith.constant dense<0.000000e+00> : vector<4x8x32xf32>
    %29 = tpu.matmul %28, %16, %cst_19 {dimension_numbers = #tpu.dot_dimension_numbers<[2], [1], [1], [2], [0, 0, 0, 1, 1, 2], [0], [0]>} : vector<4x8x8xbf16>, vector<4x8x32xbf16>, vector<4x8x32xf32> -> vector<4x8x32xf32>
    "tpu.trace_stop"() : () -> ()
    %30 = arith.truncf %29 : vector<4x8x32xf32> to vector<4x8x32xbf16>
    %c0_20 = arith.constant 0 : index
    %c0_21 = arith.constant 0 : index
    %c0_22 = arith.constant 0 : index
    %31 = vector.load %arg4[%c0_20, %c0_21, %c0_22] : memref<4x32x128xbf16, #tpu.memory_space<vmem>>, vector<4x32x128xbf16>
    "tpu.trace_start"() <{level = 10 : i32, message = "hqd,hde->hqe"}> : () -> ()
    %cst_23 = arith.constant dense<0.000000e+00> : vector<4x8x128xf32>
    %32 = tpu.matmul %30, %31, %cst_23 {dimension_numbers = #tpu.dot_dimension_numbers<[2], [1], [1], [2], [0, 0, 0, 1, 1, 2], [0], [0]>} : vector<4x8x32xbf16>, vector<4x32x128xbf16>, vector<4x8x128xf32> -> vector<4x8x128xf32>
    "tpu.trace_stop"() : () -> ()
    %cst_24 = arith.constant dense<0.000000e+00> : vector<8x128xf32>
    %33 = vector.multi_reduction <add>, %32, %cst_24 [0] : vector<4x8x128xf32> to vector<8x128xf32>
    %34 = vector.broadcast %1 : vector<1x128xf32> to vector<8x128xf32>
    %35 = arith.addf %33, %34 : vector<8x128xf32>
    %c0_25 = arith.constant 0 : index
    %36 = arith.index_cast %12 : i32 to index
    %c0_26 = arith.constant 0 : index
    %37 = vector.load %arg2[%c0_25, %36, %c0_26] : memref<1x8x128xbf16, #tpu.memory_space<vmem>>, vector<1x8x128xbf16>
    %38 = vector.shape_cast %37 : vector<1x8x128xbf16> to vector<8x128xbf16>
    %39 = arith.extf %38 : vector<8x128xbf16> to vector<8x128xf32>
    %40 = arith.addf %39, %35 : vector<8x128xf32>
    %cst_27 = arith.constant dense<0.000000e+00> : vector<8xf32>
    %41 = vector.multi_reduction <add>, %40, %cst_27 [1] : vector<8x128xf32> to vector<8xf32>
    %42 = vector.shape_cast %41 : vector<8xf32> to vector<8x1xf32>
    %cst_28 = arith.constant 1.280000e+02 : f32
    %43 = vector.broadcast %cst_28 : f32 to vector<8x1xf32>
    %44 = arith.divf %42, %43 : vector<8x1xf32>
    %45 = vector.broadcast %44 : vector<8x1xf32> to vector<8x128xf32>
    %46 = arith.subf %40, %45 : vector<8x128xf32>
    %47 = arith.mulf %46, %46 : vector<8x128xf32>
    %cst_29 = arith.constant dense<0.000000e+00> : vector<8xf32>
    %48 = vector.multi_reduction <add>, %47, %cst_29 [1] : vector<8x128xf32> to vector<8xf32>
    %49 = vector.shape_cast %48 : vector<8xf32> to vector<8x1xf32>
    %cst_30 = arith.constant 1.280000e+02 : f32
    %50 = vector.broadcast %cst_30 : f32 to vector<8x1xf32>
    %51 = arith.divf %49, %50 : vector<8x1xf32>
    %52 = vector.broadcast %44 : vector<8x1xf32> to vector<8x128xf32>
    %53 = arith.subf %40, %52 : vector<8x128xf32>
    %cst_31 = arith.constant 9.99999974E-6 : f32
    %54 = vector.broadcast %cst_31 : f32 to vector<8x1xf32>
    %55 = arith.addf %51, %54 : vector<8x1xf32>
    %56 = math.rsqrt %55 : vector<8x1xf32>
    %57 = vector.broadcast %56 : vector<8x1xf32> to vector<8x128xf32>
    %58 = arith.mulf %53, %57 : vector<8x128xf32>
    %59 = vector.broadcast %2 : vector<1x128xf32> to vector<8x128xf32>
    %60 = arith.mulf %58, %59 : vector<8x128xf32>
    %61 = vector.broadcast %3 : vector<1x128xf32> to vector<8x128xf32>
    %62 = arith.addf %60, %61 : vector<8x128xf32>
    %63 = arith.truncf %62 : vector<8x128xf32> to vector<8x128xbf16>
    %c0_32 = arith.constant 0 : index
    %c0_33 = arith.constant 0 : index
    %64 = vector.load %arg5[%c0_32, %c0_33] : memref<128x512xbf16, #tpu.memory_space<vmem>>, vector<128x512xbf16>
    %cst_34 = arith.constant dense<0.000000e+00> : vector<8x512xf32>
    %65 = tpu.matmul %63, %64, %cst_34 {dimension_numbers = #tpu.dot_dimension_numbers<[1], [0], [0], [1], [0, 0, 1, 1], [], []>} : vector<8x128xbf16>, vector<128x512xbf16>, vector<8x512xf32> -> vector<8x512xf32>
    %66 = vector.broadcast %4 : vector<1x512xf32> to vector<8x512xf32>
    %67 = arith.addf %65, %66 : vector<8x512xf32>
    %cst_35 = arith.constant 0.000000e+00 : f32
    %68 = vector.broadcast %cst_35 : f32 to vector<8x512xf32>
    %69 = arith.maximumf %67, %68 : vector<8x512xf32>
    %70 = arith.truncf %69 : vector<8x512xf32> to vector<8x512xbf16>
    %c0_36 = arith.constant 0 : index
    %c0_37 = arith.constant 0 : index
    %71 = vector.load %arg6[%c0_36, %c0_37] : memref<512x128xbf16, #tpu.memory_space<vmem>>, vector<512x128xbf16>
    %cst_38 = arith.constant dense<0.000000e+00> : vector<8x128xf32>
    %72 = tpu.matmul %70, %71, %cst_38 {dimension_numbers = #tpu.dot_dimension_numbers<[1], [0], [0], [1], [0, 0, 1, 1], [], []>} : vector<8x512xbf16>, vector<512x128xbf16>, vector<8x128xf32> -> vector<8x128xf32>
    %73 = vector.broadcast %5 : vector<1x128xf32> to vector<8x128xf32>
    %74 = arith.addf %72, %73 : vector<8x128xf32>
    %75 = arith.addf %62, %74 : vector<8x128xf32>
    %cst_39 = arith.constant dense<0.000000e+00> : vector<8xf32>
    %76 = vector.multi_reduction <add>, %75, %cst_39 [1] : vector<8x128xf32> to vector<8xf32>
    %77 = vector.shape_cast %76 : vector<8xf32> to vector<8x1xf32>
    %cst_40 = arith.constant 1.280000e+02 : f32
    %78 = vector.broadcast %cst_40 : f32 to vector<8x1xf32>
    %79 = arith.divf %77, %78 : vector<8x1xf32>
    %80 = vector.broadcast %79 : vector<8x1xf32> to vector<8x128xf32>
    %81 = arith.subf %75, %80 : vector<8x128xf32>
    %82 = arith.mulf %81, %81 : vector<8x128xf32>
    %cst_41 = arith.constant dense<0.000000e+00> : vector<8xf32>
    %83 = vector.multi_reduction <add>, %82, %cst_41 [1] : vector<8x128xf32> to vector<8xf32>
    %84 = vector.shape_cast %83 : vector<8xf32> to vector<8x1xf32>
    %cst_42 = arith.constant 1.280000e+02 : f32
    %85 = vector.broadcast %cst_42 : f32 to vector<8x1xf32>
    %86 = arith.divf %84, %85 : vector<8x1xf32>
    %87 = vector.broadcast %79 : vector<8x1xf32> to vector<8x128xf32>
    %88 = arith.subf %75, %87 : vector<8x128xf32>
    %cst_43 = arith.constant 9.99999974E-6 : f32
    %89 = vector.broadcast %cst_43 : f32 to vector<8x1xf32>
    %90 = arith.addf %86, %89 : vector<8x1xf32>
    %91 = math.rsqrt %90 : vector<8x1xf32>
    %92 = vector.broadcast %91 : vector<8x1xf32> to vector<8x128xf32>
    %93 = arith.mulf %88, %92 : vector<8x128xf32>
    %94 = vector.broadcast %6 : vector<1x128xf32> to vector<8x128xf32>
    %95 = arith.mulf %93, %94 : vector<8x128xf32>
    %96 = vector.broadcast %7 : vector<1x128xf32> to vector<8x128xf32>
    %97 = arith.addf %95, %96 : vector<8x128xf32>
    %c0_44 = arith.constant 0 : index
    %c0_45 = arith.constant 0 : index
    %c0_46 = arith.constant 0 : index
    %98 = vector.load %arg8[%c0_44, %c0_45, %c0_46] : memref<1x8x128xf32, #tpu.memory_space<vmem>>, vector<1x8x128xf32>
    %99 = vector.shape_cast %98 : vector<1x8x128xf32> to vector<8x128xf32>
    %100 = vector.shape_cast %97 : vector<8x128xf32> to vector<1x8x128xf32>
    tpu.vector_store %arg8[%c0_44, %c0_45, %c0_46], %100 {strides = array<i32>} : memref<1x8x128xf32, #tpu.memory_space<vmem>>, vector<1x8x128xf32>,
    return
  }
  func.func @transform_0(%arg0: i32, %arg1: i32) -> (i32, i32, i32) {
    %c0_i32 = arith.constant 0 : i32
    %c0_i32_0 = arith.constant 0 : i32
    %c0_i32_1 = arith.constant 0 : i32
    return %arg0, %c0_i32, %c0_i32_0 : i32, i32, i32
  }
  func.func @transform_1(%arg0: i32, %arg1: i32) -> (i32, i32) {
    %c0_i32 = arith.constant 0 : i32
    %c0_i32_0 = arith.constant 0 : i32
    %c0_i32_1 = arith.constant 0 : i32
    return %c0_i32, %c0_i32_0 : i32, i32
  }
  func.func @transform_2(%arg0: i32, %arg1: i32) -> (i32, i32, i32) {
    %c0_i32 = arith.constant 0 : i32
    %c0_i32_0 = arith.constant 0 : i32
    %c0_i32_1 = arith.constant 0 : i32
    %c0_i32_2 = arith.constant 0 : i32
    return %c0_i32, %c0_i32_0, %c0_i32_1 : i32, i32, i32
  }
  func.func @transform_3(%arg0: i32, %arg1: i32) -> (i32, i32) {
    %c0_i32 = arith.constant 0 : i32
    %c0_i32_0 = arith.constant 0 : i32
    %c0_i32_1 = arith.constant 0 : i32
    return %c0_i32, %c0_i32_0 : i32, i32
  }
  func.func @transform_4(%arg0: i32, %arg1: i32) -> (i32, i32) {
    %c0_i32 = arith.constant 0 : i32
    %c0_i32_0 = arith.constant 0 : i32
    %c0_i32_1 = arith.constant 0 : i32
    return %c0_i32, %c0_i32_0 : i32, i32
  }
  func.func @transform_5(%arg0: i32, %arg1: i32) -> (i32, i32) {
    %c0_i32 = arith.constant 0 : i32
    %c0_i32_0 = arith.constant 0 : i32
    %c0_i32_1 = arith.constant 0 : i32
    return %c0_i32, %c0_i32_0 : i32, i32
  }
  func.func @transform_6(%arg0: i32, %arg1: i32) -> (i32, i32, i32) {
    %c0_i32 = arith.constant 0 : i32
    %c0_i32_0 = arith.constant 0 : i32
    return %arg0, %arg1, %c0_i32 : i32, i32, i32
  }
}

</mosaic_0001>

<bundles_post_ra>
// kernel: tpu_custom_call.1
= control target key start
LH: loop header
LB: loop body
LE: loop exit
PB: predicated region body
PF: predicated region fallthrough
CT: control target
= control target key end

     0   :  { %s3459_s0 = inlined_call_operand.hbm [shape: bf16[2,8,128], index: 0, kind: input, shape index: {}]   ;;  %s3460_s1 = inlined_call_operand.hbm [shape: bf16[128,384], index: 1, kind: input, shape index: {}]   ;;  %s3461_s2 = inlined_call_operand.hbm [shape: bf16[4,32,128], index: 2, kind: input, shape index: {}]   ;;  %s3462_s3 = inlined_call_operand.hbm [shape: bf16[128,512], index: 3, kind: input, shape index: {}]   ;;  %s3463_s4 = inlined_call_operand.hbm [shape: bf16[512,128], index: 4, kind: input, shape index: {}]   ;;  %s3464_s5 = inlined_call_operand.hbm [shape: f32[1,1664], index: 5, kind: input, shape index: {}]   ;;  %s3465_s6 = inlined_call_operand.hbm [shape: f32[2,8,128], index: 6, kind: output, shape index: {}]  }
   0x1   :  { %3467 = sst [smem:[#allocation22_spill]] %s3460_s1 }
   0x2   :  { %3468 = sst [smem:[#allocation23_spill]] %s3461_s2 }
   0x3   :  { %3469 = sst [smem:[#allocation24_spill]] %s3462_s3 }
   0x4   :  { %11 = vsyncpa [#allocation6], 0 }
   0x5   :  { %13 = vsyncpa [#allocation6 + $0x1], 0 }
   0x6   :  { %14 = vsyncpa [#allocation9], 0 }
   0x7   :  { %15 = vsyncpa [#allocation12], 0 }
   0x8   :  { %16 = vsyncpa [#allocation15], 0 }
   0x9   :  { %17 = vsyncpa [#allocation7], 0 }
   0xa   :  { %19 = vsyncpa [#allocation7 + $0x1], 0  ;;  %s3116_s21 = smov 0   ;;  %s3118_s22 = smov 0  }
   0xb   :  { %s3120_s23 = smov 0   ;;  %s3122_s24 = smov 0  }
   0xc   :  { %s3124_s25 = smov 0   ;;  %s3126_s26 = smov 0  }
   0xd LB: > { %s2221_s27 = sadd.s32 4294967295, %s3060_s26   ;;  %p2223_p0 = scmp.ge.s32.totalorder %s3060_s26, 1  ;;  %s3060_s26 = sphi %s3126_s26, %s25_s26   ;;  %s3056_s25 = sphi %s3124_s25, %s3489_s25   ;;  %s3052_s24 = sphi %s3122_s24, %s3488_s24   ;;  %s3048_s23 = sphi %s3120_s23, %s3487_s23   ;;  %s3044_s22 = sphi %s3118_s22, %s3486_s22   ;;  %s3040_s21 = sphi %s3116_s21, %s3485_s21  }
   0xe   : > { %p3150_p1 = scmp.eq.s32.totalorder %s2221_s27, 0  ;;  %p201_p2 = scmp.lt.s32.totalorder %s3060_s26, 3 }
   0xf   : > { %s3062_s30 = smov [#allocation8]   ;;  %s3063_s9 = smov [#allocation11]  }
  0x10   : > { %p3155_p3 = pnand %p2223_p0, %p201_p2  ;;  %s213_s7 = sshll.u32 %s3062_s30, 4  ;;  %s214_s7 = int_to_ptr.vmem [resolvable:$true] %s213_s7 }
  0x11   : > { %s239_s10 = sshll.u32 %s3063_s9, 4  ;;  %s2821_s12 = scalar_lea.vmem %s214_s7, 3072  ;;  %s240_s10 = int_to_ptr.vmem [resolvable:$true] %s239_s10 }
  0x12   : > { %s3471_s29 = scalar_select %p3155_p3, 1, 0 }
  0x13   : > { %p2569_p4 = pneg %p3155_p3  ;;  %p2822_p8 = scmp.ne.s32.totalorder %s214_s7, %s2821_s12 }
  0x14   : > { %p2829_p11 = scmp.lt.s32.totalorder %s214_s7, %s214_s7  ;;  %p2830_p12 = scmp.lt.s32.totalorder %s2821_s12, %s2821_s12 }
  0x15   : > { %p3164_p6 = pnand %p2569_p4, %p3150_p1 }
  0x16   : > { %p2831_p13 = por %p2830_p12, %p2829_p11 }
  0x17   : > { %p3170_p7 = pneg %p3164_p6 }
  0x19   : > { %p2824_p9 = pnand %p2822_p8, %p3170_p7 }
  0x1b   : > { %p2825_p10 = pneg %p2824_p9 }
  0x1d   : > { %p2832_p0 = pnand %p2831_p13, %p2825_p10 }
  0x1f   : > { %2835 = shalt.err (!%p2832_p0)
}
  0x20   : > { %s3064_s13 = smov 192   ;;  %s3065_s14 = smov 12  }
  0x21   : > { %s3474_s1 = sld [smem:[#allocation22_spill]]  ;;  %s2847_s17 = scalar_lea.vmem %s240_s10, 4096 }
  0x22   : > { %p2848_p2 = scmp.ne.s32.totalorder %s240_s10, %s2847_s17  ;;  %p2855_p9 = scmp.lt.s32.totalorder %s240_s10, %s240_s10 }
  0x23   : > { %p2856_p5 = scmp.lt.s32.totalorder %s2847_s17, %s2847_s17 }
  0x24   : > { %p2850_p4 = pnand %p2848_p2, %p3170_p7 }
  0x25   : > { %p2857_p3 = por %p2856_p5, %p2855_p9 }
  0x26   : > { %p2851_p8 = pneg %p2850_p4 }
  0x27   : > { %2572 = dma.hbm_to_vmem [thread:$0]  (!%p3164_p6), %s3474_s1, 3072, %s214_s7, [#allocation9], %s3064_s13, %s3064_s13, %s3065_s14  }
  0x28   : > { %p2858_p11 = pnand %p2857_p3, %p2851_p8 }
  0x2a   : > { %2861 = shalt.err (!%p2858_p11)
}
  0x2b   : > { %s3066_s18 = smov 256   ;;  %s3067_s19 = smov 16  }
  0x2c   : > { %s3475_s3 = sld [smem:[#allocation24_spill]]  ;;  %s3068_s7 = smov [#allocation10]  }
  0x2d   : > { %s226_s9 = sshll.u32 %s3068_s7, 4  ;;  %s227_s9 = int_to_ptr.vmem [resolvable:$true] %s226_s9 }
  0x2e   : > { %s2873_s12 = scalar_lea.vmem %s227_s9, 1024  ;;  %p2881_p5 = scmp.lt.s32.totalorder %s227_s9, %s227_s9 }
  0x2f   : > { %p2874_p10 = scmp.ne.s32.totalorder %s227_s9, %s2873_s12  ;;  %p2882_p3 = scmp.lt.s32.totalorder %s2873_s12, %s2873_s12 }
  0x31   : > { %p2876_p12 = pnand %p2874_p10, %p3170_p7  ;;  %p2883_p0 = por %p2882_p3, %p2881_p5 }
  0x32   : > { %2578 = dma.hbm_to_vmem [thread:$0]  (!%p3164_p6), %s3475_s3, 4096, %s240_s10, [#allocation12], %s3066_s18, %s3066_s18, %s3067_s19  }
  0x33   : > { %p2877_p13 = pneg %p2876_p12 }
  0x35   : > { %p2884_p2 = pnand %p2883_p0, %p2877_p13 }
  0x37   : > { %2887 = shalt.err (!%p2884_p2)
}
  0x38   : > { %s3069_s13 = smov 64   ;;  %s3070_s14 = smov 4  }
  0x39   : > { %s3476_s2 = sld [smem:[#allocation23_spill]]  ;;  %s3071_s16 = smov [#allocation13]  }
  0x3a   : > { %s252_s17 = sshll.u32 %s3071_s16, 4  ;;  %s3072_s18 = smov [#allocation14]   ;;  %s253_s17 = int_to_ptr.vmem [resolvable:$true] %s252_s17 }
  0x3b   : > { %s266_s19 = sshll.u32 %s3072_s18, 4  ;;  %s2899_s20 = scalar_lea.vmem %s253_s17, 4096  ;;  %s267_s19 = int_to_ptr.vmem [resolvable:$true] %s266_s19 }
  0x3c   : > { %p2900_p4 = scmp.ne.s32.totalorder %s253_s17, %s2899_s20  ;;  %p2907_p11 = scmp.lt.s32.totalorder %s253_s17, %s253_s17 }
  0x3d   : > { %p2908_p10 = scmp.lt.s32.totalorder %s2899_s20, %s2899_s20 }
  0x3e   : > { %p2902_p8 = pnand %p2900_p4, %p3170_p7 }
  0x3f   : > { %2575 = dma.hbm_to_vmem [thread:$0]  (!%p3164_p6), %s3476_s2, 1024, %s227_s9, [#allocation9], %s3069_s13, %s3069_s13, %s3070_s14  }
  0x40   : > { %p2903_p9 = pneg %p2902_p8  ;;  %p2909_p12 = por %p2908_p10, %p2907_p11 }
  0x42   : > { %p2910_p13 = pnand %p2909_p12, %p2903_p9 }
  0x44   : > { %2913 = shalt.err (!%p2910_p13)
}
  0x45   : > { %2581 = dma.hbm_to_vmem [thread:$0]  (!%p3164_p6), %s3463_s4, 4096, %s253_s17, [#allocation12], %s3069_s13, %s3069_s13, %s3070_s14  }
  0x46   : > { %s2925_s9 = scalar_lea.vmem %s267_s19, 208  ;;  %s2932_s12 = scalar_lea.vmem %s267_s19, 224 }
  0x47   : > { %p2926_p5 = scmp.ne.s32.totalorder %s267_s19, %s2925_s9  ;;  %p2933_p2 = scmp.lt.s32.totalorder %s267_s19, %s267_s19 }
  0x48   : > { %p2934_p4 = scmp.lt.s32.totalorder %s2932_s12, %s2925_s9 }
  0x49   : > { %p2928_p3 = pnand %p2926_p5, %p3170_p7 }
  0x4a   : > { %p2935_p8 = por %p2934_p4, %p2933_p2 }
  0x4b   : > { %p2929_p0 = pneg %p2928_p3 }
  0x4d   : > { %p2936_p11 = pnand %p2935_p8, %p2929_p0 }
  0x4f   : > { %2939 = shalt.err (!%p2936_p11)
}
  0x50   : > { %2584 = dma.hbm_to_vmem [thread:$0]  (!%p3164_p6), %s3464_s5, 208, %s267_s19, [#allocation15]  }
  0x51   : > { %s2222_s11 = sadd.s32 4294967294, %s3060_s26   ;;  %s37_s13 = sadd.s32 1, %s3056_s25 }
  0x52   : > { %s44_s8 = sadd.s32 1, %s3048_s23  ;;  %p39_p7 = scmp.ge.s32.totalorder %s37_s13, 2 }
  0x53   : > { %p51_p9 = scmp.ne.s32.totalorder %s3048_s23, %s3044_s22  ;;  %p52_p10 = scmp.eq.s32.totalorder %s3060_s26, 0 }
  0x54   : > { %p57_p12 = scmp.ne.s32.totalorder %s3044_s22, %s3040_s21  ;;  %s3491_s13 = smov (%p39_p7, %s37_s13), 0 }
  0x55   : > { %p3219_p13 = por %p52_p10, %p51_p9  ;;  %s41_s17 = ssub.s32 %s3056_s25, %s3491_s13 }
  0x56   : > { %p3225_p6 = por %p3150_p1, %p57_p12  ;;  %p188_p5 = scmp.eq.s32.totalorder %s2221_s27, 1 }
  0x57   : > { %p42_p3 = scmp.eq.s32.totalorder %s41_s17, 0  ;;  %p194_p0 = scmp.eq.s32.totalorder %s2222_s11, 1 }
  0x58   : > { %p3233_p2 = por %p188_p5, %p51_p9  ;;  %p2598_p4 = scmp.lt.s32.totalorder %s3060_s26, 2 }
  0x59   : > { %s3239_s19 = scalar_select %p42_p3, %s3048_s23, %s44_s8  }
  0x5a   : > { %p3241_p8 = por %p194_p0, %p57_p12  ;;  %s277_s30 = sand.u32 1, %s3048_s23  }
  0x5b   : > { %s2230_s7 = sshll.u32 %s277_s30, 2  ;;  %s2231_s9 = sshll.u32 %s3056_s25, 6 }
  0x5c   : > { %s3480_s20 = scalar_select %p3241_p8, 1, 0 }
  0x5d   : > { %s286_s27 = scalar_lea.hbm %s3459_s0, %s2231_s9  ;;  %s281_s10 = scalar_lea.vmem [#allocation5], %s2230_s7 }
  0x5e   : > { %s288_s11 = sshll.u32 %s281_s10, 4  ;;  %p3252_p11 = pnand %p2598_p4, %p3219_p13  ;;  %s289_s11 = int_to_ptr.vmem [resolvable:$true] %s288_s11 }
  0x5f   : > { %s278_s8 = scalar_lea.sflag [#allocation6], %s277_s30  ;;  %s2953_s1 = scalar_lea.vmem %s289_s11, 64 }
  0x60   : > { %p2942_p7 = pneg %p3252_p11  ;;  %p2954_p9 = scmp.ne.s32.totalorder %s289_s11, %s2953_s1 }
  0x61   : > { %s3073_s2 = smov [#allocation5]  }
  0x62   : > { %p2956_p10 = pnand %p2954_p9, %p2942_p7  ;;  %s2958_s3 = sshll.u32 %s3073_s2, 4  ;;  %s2959_s3 = int_to_ptr.vmem [resolvable:$false] %s2958_s3 }
  0x63   : > { %s2960_s9 = scalar_lea.vmem %s2959_s3, 128  ;;  %p2961_p5 = scmp.lt.s32.totalorder %s289_s11, %s2959_s3 }
  0x64   : > { %p2957_p12 = pneg %p2956_p10  ;;  %p2962_p3 = scmp.lt.s32.totalorder %s2960_s9, %s2953_s1 }
  0x66   : > { %p2963_p0 = por %p2962_p3, %p2961_p5 }
  0x68   : > { %p2964_p8 = pnand %p2963_p0, %p2957_p12 }
  0x6a   : > { %2967 = shalt.err (!%p2964_p8)
}
  0x6b   : > { %2588 = dma.hbm_to_vmem [thread:$0]  (!%p3252_p11), %s286_s27, 64, %s289_s11, %s278_s8  }
  0x6c   : > { %p3482_p13 = scmp.ne.s32.totalorder %s3471_s29, 0 }
  0x6d   : > { %s3263_s14 = sand.u32 (!%p3482_p13), 1, %s3044_s22  }
  0x6e   : > { %297 = sbr.rel (%p3482_p13) target bundleno = 2426 (0x97a), region = 44  ;;  %s2233_s2 = sshll.u32 (!%p3482_p13), %s3263_s14, 2 }
  0x6f   : > { %s300_s30 = scalar_lea.sflag (!%p3482_p13), [#allocation6], %s3263_s14  ;;  %s3267_s7 = scalar_lea.vmem (!%p3482_p13), [#allocation5], %s2233_s2 }
  0x73   : > { %3019 = dma.done.wait (%p3225_p6), %s300_s30, 64  }
  0x74   : > { %3021 = vsyncadd (%p3225_p6), %s300_s30, 4294967232 }
  0x75   : > { %3023 = dma.done.wait (%p3150_p1), [#allocation9], 4096  }
  0x76   : > { %3025 = vsyncadd (%p3150_p1), [#allocation9], 4294963200 }
  0x77   : > { %3027 = dma.done.wait (%p3150_p1), [#allocation12], 8192  }
  0x78   : > { %3029 = vsyncadd (%p3150_p1), [#allocation12], 4294959104 }
  0x79   : > { %3031 = dma.done.wait (%p3150_p1), [#allocation15], 208  }
  0x7a   : > { %3033 = vsyncadd (%p3150_p1), [#allocation15], 4294967088  ;;  %v3074_v0 = vmov 0   ;;  %v2670_v1 = vld [vmem:[#allocation8 + $0xac] ss:$12 sps:$4 sm:$0xff]   ;;  %v3075_v18 = vmov 0.0   ;;  %v399_v27 = vlaneseq }
  0x7b   : > { %574 = vmatprep.mubr.bf16.mxu0 %v3074_v0  ;;  %v2672_v2 = vld [vmem:[#allocation8 + $0xa8] ss:$12 sps:$4 sm:$0xff]   ;;  %542 = vmatprep.subr.bf16.mxu0 %v2670_v1  ;;  %v2675_v4 = vld [vmem:[#allocation8 + $0x90] ss:$12 sps:$4 sm:$0xff]   ;;  %v2678_v6 = vld [vmem:[#allocation8 + $0x78] ss:$12 sps:$4 sm:$0xff]  }
  0x7c   : > { %v2673_v3 = vld [vmem:[#allocation8 + $0x94] ss:$12 sps:$4 sm:$0xff]   ;;  %543 = vmatpush1.bf16.msra.mxu0 %v2672_v2  ;;  %v2676_v5 = vld [vmem:[#allocation8 + $0x7c] ss:$12 sps:$4 sm:$0xff]   ;;  %v2679_v7 = vld [vmem:[#allocation8 + $0x64] ss:$12 sps:$4 sm:$0xff]   ;;  %2445 = vmatprep.subr.bf16.mxu1 %v3075_v18 }
  0x7d   : > { %544 = vmatprep.subr.bf16.mxu0 %v2673_v3  ;;  %v2681_v8 = vld [vmem:[#allocation8 + $0x60] ss:$12 sps:$4 sm:$0xff]   ;;  %v2684_v10 = vld [vmem:[#allocation8 + $0x48] ss:$12 sps:$4 sm:$0xff]   ;;  %v2687_v12 = vld [vmem:[#allocation8 + $0x30] ss:$12 sps:$4 sm:$0xff]  }
  0x7e   : > { %v2682_v9 = vld [vmem:[#allocation8 + $0x4c] ss:$12 sps:$4 sm:$0xff]   ;;  %v2685_v11 = vld [vmem:[#allocation8 + $0x34] ss:$12 sps:$4 sm:$0xff]   ;;  %v2688_v13 = vld [vmem:[#allocation8 + $0x1c] ss:$12 sps:$4 sm:$0xff]  }
  0x7f   : > { %v2690_v14 = vld [vmem:[#allocation8 + $0x18] ss:$12 sps:$4 sm:$0xff]   ;;  %v2693_v16 = vld [vmem:[#allocation8] ss:$12 sps:$4 sm:$0xff]   ;;  %vm3076_vm0 = vmmov 0   ;;  %v3303_v28 = vshrl.u32 %v399_v27, 7 }
  0x80   : > { %545 = vmatpush1.bf16.msra.mxu0 %v2675_v4  ;;  %v2691_v15 = vld [vmem:[#allocation8 + $0x4] ss:$12 sps:$4 sm:$0xff]   ;;  %v365_v17 = vld [vmem:[%s3267_s7] sm:$0xf]  ;;  %2461 = vmatprep.mubr.msk.bf16.mxu1 %vm3076_vm0, %v3075_v18  ;;  %v2696_v21 = vld [vmem:[#allocation8 + $0x80] ss:$12 sps:$4 sm:$0xff]  }
  0x81   : > { %546 = vmatprep.subr.bf16.mxu0 %v2676_v5  ;;  %v2694_v19 = vld [vmem:[#allocation8 + $0xb0] ss:$12 sps:$4 sm:$0xff]   ;;  %v2695_v20 = vld [vmem:[#allocation8 + $0x98] ss:$12 sps:$4 sm:$0xff]   ;;  %v2697_v22 = vld [vmem:[#allocation8 + $0x68] ss:$12 sps:$4 sm:$0xff]  }
  0x82   : > { %2446 = vmatpush3.bf16.msra.mxu1 %v2694_v19  ;;  %v2698_v23 = vld [vmem:[#allocation8 + $0x50] ss:$12 sps:$4 sm:$0xff]   ;;  %v2699_v24 = vld [vmem:[#allocation8 + $0x38] ss:$12 sps:$4 sm:$0xff]   ;;  %v2700_v25 = vld [vmem:[#allocation8 + $0x20] ss:$12 sps:$4 sm:$0xff]  }
  0x83   : > { %2447 = vmatprep.subr.bf16.mxu1 %v3075_v18  ;;  %v2701_v26 = vld [vmem:[#allocation8 + $0x8] ss:$12 sps:$4 sm:$0xff]   ;;  %v401_v29 = vsub.s32 0, %v3303_v28  ;;  %v353_v30 = vld [vmem:[#allocation14] sm:$0x7]  ;;  %v405_v31 = vsub.s32 1, %v3303_v28 }
  0x84   : > { %547 = vmatpush1.bf16.msra.mxu0 %v2678_v6  ;;  %vm625_vm1 = vcmask 257024   ;;  %s3077_s1 = smov 96   ;;  %s3078_s3 = smov 64   ;;  %vm702_vm2 = vcmask 261120   ;;  %v409_v46 = vsub.s32 2, %v3303_v28  ;;  %vm939_vm3 = vcmask 1043456  }
  0x85   : > { %548 = vmatprep.subr.bf16.mxu0 %v2679_v7  ;;  %v402_v32 = vrot.slane %v353_v30, %v401_v29  ;;  %v406_v33 = vrot.slane %v353_v30, %v405_v31  ;;  %s3079_s28 = smov 32   ;;  %vm887_vm4 = vcmask 64512   ;;  %s2239_s29 = sshll.u32 %s3263_s14, 3 }
  0x86   : > { %2448 = vmatpush3.bf16.msra.mxu1 %v2695_v20  ;;  %v410_v47 = vrot.slane %v353_v30, %v409_v46  ;;  %s2358_s16 = sshll.u32 %s3052_s24, 7  ;;  %s351_s12 = scalar_lea.vmem [#allocation16], %s2239_s29 }
  0x87   : > { %2449 = vmatprep.subr.bf16.mxu1 %v3075_v18  ;;  %s2090_s15 = sshll.u32 %s351_s12, 4  ;;  %s2088_s11 = scalar_lea.hbm %s3465_s6, %s2358_s16  ;;  %s2091_s15 = int_to_ptr.vmem [resolvable:$true] %s2090_s15 }
  0x88   : > { %549 = vmatpush1.bf16.msra.mxu0 %v2681_v8  ;;  %s2076_s17 = scalar_lea.sflag [#allocation7], %s3263_s14  ;;  %s2968_s8 = scalar_lea.vmem %s2091_s15, 128 }
  0x89   : > { %550 = vmatprep.subr.bf16.mxu0 %v2682_v9  ;;  %p2969_p1 = scmp.ne.s32.totalorder %s2091_s15, %s2968_s8  ;;  %s3080_s9 = smov [#allocation16]  }
  0x8a   : > { %2450 = vmatpush3.bf16.msra.mxu1 %v2696_v21  ;;  %s2972_s2 = sshll.u32 %s3080_s9, 4  ;;  %s2973_s2 = int_to_ptr.vmem [resolvable:$false] %s2972_s2 }
  0x8b   : > { %2451 = vmatprep.subr.bf16.mxu1 %v3075_v18  ;;  %p2970_p6 = pnand %p2969_p1, %p3233_p2  ;;  %s2974_s24 = scalar_lea.vmem %s2973_s2, 256 }
  0x8c   : > { %551 = vmatpush1.bf16.msra.mxu0 %v2684_v10  ;;  %p2975_p8 = scmp.lt.s32.totalorder %s2091_s15, %s2973_s2  ;;  %p2976_p11 = scmp.lt.s32.totalorder %s2974_s24, %s2968_s8 }
  0x8d   : > { %552 = vmatprep.subr.bf16.mxu0 %v2685_v11  ;;  %p2971_p4 = pneg %p2970_p6 }
  0x8e   : > { %2452 = vmatpush3.bf16.msra.mxu1 %v2697_v22  ;;  %p2977_p7 = por %p2976_p11, %p2975_p8 }
  0x8f   : > { %2453 = vmatprep.subr.bf16.mxu1 %v3075_v18 }
  0x90   : > { %553 = vmatpush1.bf16.msra.mxu0 %v2687_v12  ;;  %p2978_p9 = pnand %p2977_p7, %p2971_p4 }
  0x91   : > { %554 = vmatprep.subr.bf16.mxu0 %v2688_v13 }
  0x92   : > { %2454 = vmatpush3.bf16.msra.mxu1 %v2698_v23 }
  0x93   : > { %2455 = vmatprep.subr.bf16.mxu1 %v3075_v18 }
  0x94   : > { %555 = vmatpush1.bf16.msra.mxu0 %v2690_v14 }
  0x95   : > { %556 = vmatprep.subr.bf16.mxu0 %v2691_v15 }
  0x96   : > { %2456 = vmatpush3.bf16.msra.mxu1 %v2699_v24 }
  0x97   : > { %2457 = vmatprep.subr.bf16.mxu1 %v3075_v18 }
  0x98   : > { %557 = vmatpush1.bf16.msra.mxu0 %v2693_v16 }
  0x99   : > { %2465 = vmatprep.subr.bf16.mxu0 %v3075_v18 }
  0x9a   : > { %2458 = vmatpush3.bf16.msra.mxu1 %v2700_v25 }
  0x9b   : > { %575 = vmatmul.mubr.bf16.vlgmr.msra.gmra.mxu0 %v365_v17  ;;  %2459 = vmatprep.subr.bf16.mxu1 %v3075_v18 }
  0x9c   : > { %2467 = vmatprep.mubr.msk.bf16.mxu0 %vm3076_vm0, %v3075_v18 }
  0x9e   : > { %2460 = vmatpush3.bf16.msra.mxu1 %v2701_v26 }
  0x9f   : > { %2471 = vmatprep.subr.bf16.mxu1 %v3075_v18 }
  0xa1   : > { %2462 = vmatmul.mubr.bf16.vlgmr.msra.gmra.mxu1 %v365_v17 }
  0xa2   : > { %2473 = vmatprep.mubr.msk.bf16.mxu1 %vm3076_vm0, %v3075_v18 }
 0x15b   : > { %v576_v34 = vpop.f32.mrf.mxu0 }
 0x15c   : > { %v577_v35 = vadd.f32 %v576_v34, %v402_v32 }
 0x15d   : > { %v578_v36 = vpop.f32.mrf.mxu0 }
 0x15e   : > { %v623_v37 = vmul.f32 0.17677669, %v577_v35  ;;  %v579_v38 = vadd.f32 %v578_v36, %v406_v33 }
 0x15f   : > { %v580_v39 = vpop.f32.mrf.mxu0 }
 0x160   : > { %v624_v40 = vpack.c.bf16 %v623_v37, %v623_v37  ;;  %v627_v41 = vpack.c.bf16 %v579_v38, %v579_v38 }
 0x161   : > { %v581_v42 = vpop.f32.mrf.mxu0  ;;  %v617_v48 = vpop.f32.mrf.mxu1 }
 0x162   : > { %626 = vst.msk [vmem:[#allocation2] sm:$0xf] %vm625_vm1, %v624_v40  ;;  %628 = vst.msk [vmem:[#allocation3] sm:$0xf] %vm625_vm1, %v627_v41  ;;  %642 = vrot.lane.b32.xlu0 %v627_v41, %s3077_s1  ;;  %634 = vrot.lane.b32.xlu1 %v624_v40, %s3077_s1  ;;  %v618_v51 = vadd.f32 %v617_v48, %v410_v47 }
 0x163   : > { %v2463_v52 = vpop.f32.mrf.mxu1 }
 0x164   : > { %v3329_v53 = vpack.c.bf16 %v618_v51, %v618_v51 }
 0x165   : > { %v620_v54 = vpop.f32.mrf.mxu1 }
 0x166   : > { %660 = vrot.lane.b32.xlu0 %v627_v41, %s3078_s3  ;;  %675 = vrot.lane.b32.xlu1 %v627_v41, %s3079_s28  ;;  %630 = vst.msk [vmem:[#allocation4] sm:$0xf] %vm625_vm1, %v3329_v53 }
 0x167   : > { %v2464_v57 = vpop.f32.mrf.mxu1 }
 0x169   : > { %v694_v43 = vld [vmem:[#allocation3] sm:$0xf]  ;;  %v690_v45 = vld [vmem:[#allocation2] sm:$0xf] }
 0x16a   : > { %655 = vrot.lane.b32.xlu0 %v624_v40, %s3078_s3  ;;  %670 = vrot.lane.b32.xlu1 %v624_v40, %s3079_s28  ;;  %v707_v44 = vsel %vm702_vm2, %v694_v43, 0 }
 0x16b   : > { %2466 = vmatpush3.bf16.xpose.msra.mxu0 %v707_v44 }
 0x16c   : > { %2477 = vmatprep.subr.bf16.mxu0 %v3075_v18 }
 0x16d   : > { %v698_v6 = vld [vmem:[#allocation4] sm:$0xf] }
 0x16e   : > { %v941_v7 = vsel %vm939_vm3, %v698_v6, 0 }
 0x172   : > { %2468 = vmatmul.mubr.msk.bf16.vlgmr.msra.gmra.mxu0 %vm702_vm2, %v690_v45 }
 0x173   : > { %2479 = vmatprep.mubr.msk.bf16.mxu0 %vm3076_vm0, %v3075_v18 }
 0x1d4   : > { %v643_v49 = vpop.permute.xlu0 %642  ;;  %v635_v50 = vpop.permute.xlu1 %634 }
 0x1d5   : > { %646 = vst.msk [vmem:[#allocation3 + $0x4] sm:$0xf] %vm625_vm1, %v643_v49  ;;  %638 = vst.msk [vmem:[#allocation2 + $0x4] sm:$0xf] %vm625_vm1, %v635_v50 }
 0x1d8   : > { %v661_v55 = vpop.permute.xlu0 %660  ;;  %v676_v56 = vpop.permute.xlu1 %675 }
 0x1d9   : > { %664 = vst.msk [vmem:[#allocation3 + $0x8] sm:$0xf] %vm625_vm1, %v661_v55  ;;  %679 = vst.msk [vmem:[#allocation3 + $0xc] sm:$0xf] %vm625_vm1, %v676_v56 }
 0x1dc   : > { %v656_v58 = vpop.permute.xlu0 %655  ;;  %v671_v59 = vpop.permute.xlu1 %670  ;;  %v695_v60 = vld [vmem:[#allocation3 + $0x4] sm:$0xf]  ;;  %v691_v2 = vld [vmem:[#allocation2 + $0x4] sm:$0xf] }
 0x1dd   : > { %659 = vst.msk [vmem:[#allocation2 + $0x8] sm:$0xf] %vm625_vm1, %v656_v58  ;;  %674 = vst.msk [vmem:[#allocation2 + $0xc] sm:$0xf] %vm625_vm1, %v671_v59  ;;  %v753_v61 = vsel %vm702_vm2, %v695_v60, 0 }
 0x1de   : > { %2472 = vmatpush3.bf16.xpose.msra.mxu1 %v753_v61 }
 0x1df   : > { %2483 = vmatprep.subr.bf16.mxu1 %v3075_v18 }
 0x1e0   : > { %v696_v62 = vld [vmem:[#allocation3 + $0x8] sm:$0xf]  ;;  %v697_v1 = vld [vmem:[#allocation3 + $0xc] sm:$0xf] }
 0x1e1   : > { %v799_v63 = vsel %vm702_vm2, %v696_v62, 0  ;;  %v845_v3 = vsel %vm702_vm2, %v697_v1, 0 }
 0x1e2   : > { %2478 = vmatpush3.bf16.xpose.msra.mxu0 %v799_v63 }
 0x1e3   : > { %2489 = vmatprep.subr.bf16.mxu0 %v3075_v18 }
 0x1e4   : > { %v692_v4 = vld [vmem:[#allocation2 + $0x8] sm:$0xf]  ;;  %v693_v5 = vld [vmem:[#allocation2 + $0xc] sm:$0xf] }
 0x1e5   : > { %2474 = vmatmul.mubr.msk.bf16.vlgmr.msra.gmra.mxu1 %vm702_vm2, %v691_v2 }
 0x1e6   : > { %2484 = vmatpush3.bf16.xpose.msra.mxu1 %v845_v3  ;;  %2485 = vmatprep.mubr.msk.bf16.mxu1 %vm3076_vm0, %v3075_v18 }
 0x1e7   : > { %2495 = vmatprep.subr.bf16.mxu1 %v3075_v18 }
 0x1e9   : > { %2480 = vmatmul.mubr.msk.bf16.vlgmr.msra.gmra.mxu0 %vm702_vm2, %v692_v4 }
 0x1ea   : > { %2491 = vmatprep.mubr.msk.bf16.mxu0 %vm3076_vm0, %v3075_v18  ;;  %2490 = vmatpush3.bf16.msra.mxu0 %v941_v7 }
 0x1eb   : > { %2501 = vmatprep.subr.bf16.mxu0 %v3075_v18 }
 0x1ed   : > { %2486 = vmatmul.mubr.msk.bf16.vlgmr.msra.gmra.mxu1 %vm702_vm2, %v693_v5 }
 0x1ee   : > { %2497 = vmatprep.mubr.msk.bf16.mxu1 %vm3076_vm0, %v3075_v18 }
 0x232   : > { %v743_v8 = vpop.f32.mrf.mxu0 }
 0x233   : > { %v888_v9 = vsel %vm887_vm4, %v743_v8, -inf }
 0x234   : > { %889 = vmax.xlane.f32.xlu0 %v888_v9  ;;  %v2469_v10 = vpop.f32.mrf.mxu0 }
 0x236   : > { %v746_v11 = vpop.f32.mrf.mxu0 }
 0x238   : > { %v2470_v12 = vpop.f32.mrf.mxu0 }
 0x239   : > { %v2702_v12 = vld [vmem:[#allocation10 + $0x8] sm:$0xff]  }
 0x2a5   : > { %v789_v13 = vpop.f32.mrf.mxu1 }
 0x2a6   : > { %v891_v14 = vsel %vm887_vm4, %v789_v13, -inf }
 0x2a7   : > { %892 = vmax.xlane.f32.xlu1 %v891_v14  ;;  %v2475_v15 = vpop.f32.mrf.mxu1 }
 0x2a8   : > { %v2704_v15 = vld [vmem:[#allocation10 + $0x18] sm:$0xff]  }
 0x2a9   : > { %v792_v16 = vpop.f32.mrf.mxu1  ;;  %v835_v17 = vpop.f32.mrf.mxu0 }
 0x2aa   : > { %v894_v19 = vsel %vm887_vm4, %v835_v17, -inf }
 0x2ab   : > { %v2476_v20 = vpop.f32.mrf.mxu1  ;;  %895 = vmax.xlane.f32.xlu0 %v894_v19  ;;  %v2481_v21 = vpop.f32.mrf.mxu0  ;;  %v2705_v19 = vld [vmem:[#allocation10 + $0x10] sm:$0xff]  }
 0x2ac   : > { %v2706_v21 = vld [vmem:[#allocation10 + $0x28] sm:$0xff]  }
 0x2ad   : > { %v838_v22 = vpop.f32.mrf.mxu0  ;;  %v881_v23 = vpop.f32.mrf.mxu1 }
 0x2ae   : > { %v897_v24 = vsel %vm887_vm4, %v881_v23, -inf }
 0x2af   : > { %v2487_v25 = vpop.f32.mrf.mxu1  ;;  %898 = vmax.xlane.f32.xlu0 %v897_v24  ;;  %v2482_v26 = vpop.f32.mrf.mxu0 }
 0x2b0   : > { %v2708_v25 = vld [vmem:[#allocation10 + $0x20] sm:$0xff]  }
 0x2b1   : > { %v884_v27 = vpop.f32.mrf.mxu1 }
 0x2b3   : > { %v2488_v30 = vpop.f32.mrf.mxu1 }
 0x2b4   : > { %v2707_v30 = vld [vmem:[#allocation10 + $0x38] sm:$0xff]  }
 0x2b8   : > { %650 = vrot.lane.b32.xlu1 %v3329_v53, %s3077_s1 }
 0x2bd   : > { %v890_v32 = vpop.xlane.xlu0 %889 }
 0x2be   : > { %v900_v33 = vsub.f32 %v743_v8, %v890_v32 }
 0x2c0   : > { %v904_v34 = vmul.f32 1.442695, %v900_v33 }
 0x2c2   : > { %2790 = vpow2.f32 %v904_v34 }
 0x2cf   : > { %v2791_v35 = vpop.eup %2790 }
 0x2d0   : > { %v912_v36 = vsel %vm887_vm4, %v2791_v35, 0.0 }
 0x2dc   : > { %913 = vadd.xlane.f32.xlu1 %v912_v36 }
 0x330   : > { %v893_v37 = vpop.xlane.xlu1 %892 }
 0x331   : > { %v901_v38 = vsub.f32 %v789_v13, %v893_v37 }
 0x333   : > { %v906_v39 = vmul.f32 1.442695, %v901_v38 }
 0x334   : > { %v651_v40 = vpop.permute.xlu1 %650  ;;  %v896_v41 = vpop.xlane.xlu0 %895 }
 0x335   : > { %2792 = vpow2.f32 %v906_v39  ;;  %654 = vst.msk [vmem:[#allocation4 + $0x4] sm:$0xf] %vm625_vm1, %v651_v40  ;;  %v902_v42 = vsub.f32 %v835_v17, %v896_v41  ;;  %v2703_v17 = vld [vmem:[#allocation10] sm:$0xff]  }
 0x337   : > { %v908_v43 = vmul.f32 1.442695, %v902_v42 }
 0x338   : > { %v899_v44 = vpop.xlane.xlu0 %898 }
 0x339   : > { %2794 = vpow2.f32 %v908_v43  ;;  %v903_v45 = vsub.f32 %v881_v23, %v899_v44 }
 0x33b   : > { %v910_v47 = vmul.f32 1.442695, %v903_v45 }
 0x33c   : > { %v699_v48 = vld [vmem:[#allocation4 + $0x4] sm:$0xf] }
 0x33d   : > { %2796 = vpow2.f32 %v910_v47  ;;  %v987_v49 = vsel %vm939_vm3, %v699_v48, 0 }
 0x33e   : > { %2496 = vmatpush3.bf16.msra.mxu1 %v987_v49 }
 0x33f   : > { %2507 = vmatprep.subr.bf16.mxu1 %v3075_v18 }
 0x342   : > { %v2793_v50 = vpop.eup %2792 }
 0x343   : > { %v915_v51 = vsel %vm887_vm4, %v2793_v50, 0.0 }
 0x344   : > { %916 = vadd.xlane.f32.xlu0 %v915_v51 }
 0x346   : > { %v2795_v52 = vpop.eup %2794 }
 0x347   : > { %v918_v54 = vsel %vm887_vm4, %v2795_v52, 0.0 }
 0x348   : > { %919 = vadd.xlane.f32.xlu1 %v918_v54 }
 0x34a   : > { %v2797_v55 = vpop.eup %2796 }
 0x34b   : > { %v921_v56 = vsel %vm887_vm4, %v2797_v55, 0.0 }
 0x34c   : > { %922 = vadd.xlane.f32.xlu0 %v921_v56 }
 0x359   : > { %680 = vrot.lane.b32.xlu1 %v3329_v53, %s3079_s28 }
 0x362   : > { %665 = vrot.lane.b32.xlu0 %v3329_v53, %s3078_s3 }
 0x365   : > { %v914_v57 = vpop.xlane.xlu1 %913 }
 0x366   : > { %2798 = vrcp.f32 %v914_v57 }
 0x373   : > { %v2799_v58 = vpop.eup %2798 }
 0x374   : > { %v928_v59 = vmul.f32 %v2799_v58, %v2791_v35  ;;  %v2709_v35 = vld [vmem:[#allocation10 + $0x30] sm:$0xff]   ;;  %v1373_v58 = vld [vmem:[%s3267_s7] sm:$0xf] }
 0x376   : > { %v932_v60 = vpack.c.bf16 %v928_v59, %v928_v59 }
 0x378   : > { %2492 = vmatmul.mubr.msk.bf16.vlgmr.msra.gmra.mxu0 %vm887_vm4, %v932_v60 }
 0x379   : > { %2503 = vmatprep.mubr.msk.bf16.mxu0 %vm3076_vm0, %v3075_v18 }
 0x3cd   : > { %v917_v61 = vpop.xlane.xlu0 %916 }
 0x3ce   : > { %2800 = vrcp.f32 %v917_v61  ;;  %v2287_v61 = vld [vmem:[#allocation14 + $0x3] ss:$0 sm:$0xff] }
 0x3d1   : > { %v920_v62 = vpop.xlane.xlu1 %919 }
 0x3d2   : > { %2802 = vrcp.f32 %v920_v62 }
 0x3d5   : > { %v681_v63 = vpop.permute.xlu1 %680  ;;  %v923_v1 = vpop.xlane.xlu0 %922 }
 0x3d6   : > { %684 = vst.msk [vmem:[#allocation4 + $0xc] sm:$0xf] %vm625_vm1, %v681_v63  ;;  %2804 = vrcp.f32 %v923_v1  ;;  %v1374_v1 = vunpack.c.l.bf16 %v1373_v58 }
 0x3d9   : > { %v666_v53 = vpop.permute.xlu0 %665 }
 0x3da   : > { %669 = vst.msk [vmem:[#allocation4 + $0x8] sm:$0xf] %vm625_vm1, %v666_v53 }
 0x3db   : > { %v2801_v2 = vpop.eup %2800 }
 0x3dc   : > { %v929_v3 = vmul.f32 %v2801_v2, %v2793_v50 }
 0x3dd   : > { %v701_v4 = vld [vmem:[#allocation4 + $0xc] sm:$0xf] }
 0x3de   : > { %v933_v5 = vpack.c.bf16 %v929_v3, %v929_v3  ;;  %v1079_v6 = vsel %vm939_vm3, %v701_v4, 0 }
 0x3df   : > { %v2803_v7 = vpop.eup %2802 }
 0x3e0   : > { %2498 = vmatmul.mubr.msk.bf16.vlgmr.msra.gmra.mxu1 %vm887_vm4, %v933_v5  ;;  %v930_v8 = vmul.f32 %v2803_v7, %v2795_v52  ;;  %v2710_v7 = vld [vmem:[#allocation11 + $0xe0] ss:$16 sps:$4 sm:$0xff]  }
 0x3e1   : > { %2508 = vmatpush3.bf16.msra.mxu1 %v1079_v6  ;;  %v700_v9 = vld [vmem:[#allocation4 + $0x8] sm:$0xf]  ;;  %2509 = vmatprep.mubr.msk.bf16.mxu1 %vm3076_vm0, %v3075_v18 }
 0x3e2   : > { %v1033_v10 = vsel %vm939_vm3, %v700_v9, 0  ;;  %2521 = vmatprep.subr.bf16.mxu1 %v3075_v18  ;;  %v934_v13 = vpack.c.bf16 %v930_v8, %v930_v8  ;;  %v2712_v8 = vld [vmem:[#allocation11 + $0xe4] ss:$16 sps:$4 sm:$0xff]   ;;  %v2713_v9 = vld [vmem:[#allocation11 + $0xe8] ss:$16 sps:$4 sm:$0xff]  }
 0x3e3   : > { %v2805_v11 = vpop.eup %2804  ;;  %2502 = vmatpush3.bf16.msra.mxu0 %v1033_v10  ;;  %v2715_v10 = vld [vmem:[#allocation11 + $0xec] ss:$16 sps:$4 sm:$0xff]  }
 0x3e4   : > { %v931_v14 = vmul.f32 %v2805_v11, %v2797_v55  ;;  %2513 = vmatprep.subr.bf16.mxu0 %v3075_v18  ;;  %v2718_v11 = vld [vmem:[#allocation11 + $0xc4] ss:$16 sps:$4 sm:$0xff]  }
 0x3e6   : > { %2504 = vmatmul.mubr.msk.bf16.vlgmr.msra.gmra.mxu0 %vm887_vm4, %v934_v13  ;;  %v935_v16 = vpack.c.bf16 %v931_v14, %v931_v14  ;;  %v2716_v13 = vld [vmem:[#allocation11 + $0xc0] ss:$16 sps:$4 sm:$0xff]   ;;  %v2719_v14 = vld [vmem:[#allocation11 + $0xc8] ss:$16 sps:$4 sm:$0xff]  }
 0x3e7   : > { %2514 = vmatpush3.bf16.msra.mxu0 %v2702_v12  ;;  %2517 = vmatprep.mubr.msk.bf16.mxu0 %vm3076_vm0, %v3075_v18  ;;  %v2721_v12 = vld [vmem:[#allocation11 + $0xcc] ss:$16 sps:$4 sm:$0xff]  }
 0x3e8   : > { %2510 = vmatmul.mubr.msk.bf16.vlgmr.msra.gmra.mxu1 %vm887_vm4, %v935_v16  ;;  %2515 = vmatprep.subr.bf16.mxu0 %v3075_v18 }
 0x3e9   : > { %2522 = vmatpush3.bf16.msra.mxu1 %v2704_v15  ;;  %2525 = vmatprep.mubr.msk.bf16.mxu1 %vm3076_vm0, %v3075_v18 }
 0x3ea   : > { %2523 = vmatprep.subr.bf16.mxu1 %v3075_v18 }
 0x3eb   : > { %2516 = vmatpush3.bf16.msra.mxu0 %v2703_v17 }
 0x3ec   : > { %2529 = vmatprep.subr.bf16.mxu0 %v3075_v18 }
 0x3ed   : > { %2524 = vmatpush3.bf16.msra.mxu1 %v2705_v19 }
 0x3ee   : > { %2537 = vmatprep.subr.bf16.mxu1 %v3075_v18 }
 0x438   : > { %v977_v20 = vpop.f32.mrf.mxu0 }
 0x439   : > { %v1121_v22 = vpack.c.bf16 %v977_v20, %v977_v20  ;;  %v2724_v20 = vld [vmem:[#allocation11 + $0xa4] ss:$16 sps:$4 sm:$0xff]  }
 0x43a   : > { %v2493_v23 = vpop.f32.mrf.mxu0 }
 0x43b   : > { %2518 = vmatmul.mubr.msk.bf16.vlgmr.msra.gmra.mxu0 %vm702_vm2, %v1121_v22  ;;  %v2722_v22 = vld [vmem:[#allocation11 + $0xa0] ss:$16 sps:$4 sm:$0xff]   ;;  %v2725_v23 = vld [vmem:[#allocation11 + $0xa8] ss:$16 sps:$4 sm:$0xff]  }
 0x43c   : > { %v980_v24 = vpop.f32.mrf.mxu0  ;;  %2530 = vmatpush3.bf16.msra.mxu0 %v2706_v21  ;;  %2533 = vmatprep.mubr.msk.bf16.mxu0 %vm3076_vm0, %v3075_v18  ;;  %v2727_v21 = vld [vmem:[#allocation11 + $0xac] ss:$16 sps:$4 sm:$0xff]  }
 0x43d   : > { %2531 = vmatprep.subr.bf16.mxu0 %v3075_v18  ;;  %v2728_v24 = vld [vmem:[#allocation11 + $0x80] ss:$16 sps:$4 sm:$0xff]  }
 0x43e   : > { %v2494_v26 = vpop.f32.mrf.mxu0 }
 0x43f   : > { %v2731_v26 = vld [vmem:[#allocation11 + $0x88] ss:$16 sps:$4 sm:$0xff]  }
 0x440   : > { %2532 = vmatpush3.bf16.msra.mxu0 %v2708_v25  ;;  %v2730_v25 = vld [vmem:[#allocation11 + $0x84] ss:$16 sps:$4 sm:$0xff]  }
 0x441   : > { %1616 = vmatprep.subr.bf16.mxu0 %v2712_v8  ;;  %v2773_v8 = vld [vmem:[#allocation13 + $0xa0] sm:$0xff]  }
 0x4a0   : > { %v1023_v27 = vpop.f32.mrf.mxu1 }
 0x4a1   : > { %v1122_v32 = vpack.c.bf16 %v1023_v27, %v1023_v27  ;;  %v2733_v27 = vld [vmem:[#allocation11 + $0x8c] ss:$16 sps:$4 sm:$0xff]  }
 0x4a2   : > { %v2499_v33 = vpop.f32.mrf.mxu1 }
 0x4a3   : > { %2526 = vmatmul.mubr.msk.bf16.vlgmr.msra.gmra.mxu1 %vm702_vm2, %v1122_v32  ;;  %v2739_v32 = vld [vmem:[#allocation11 + $0x6c] ss:$16 sps:$4 sm:$0xff]   ;;  %v2734_v33 = vld [vmem:[#allocation11 + $0x60] ss:$16 sps:$4 sm:$0xff]  }
 0x4a4   : > { %v1026_v34 = vpop.f32.mrf.mxu1  ;;  %2538 = vmatpush3.bf16.msra.mxu1 %v2707_v30  ;;  %2541 = vmatprep.mubr.msk.bf16.mxu1 %vm3076_vm0, %v3075_v18  ;;  %v2736_v30 = vld [vmem:[#allocation11 + $0x64] ss:$16 sps:$4 sm:$0xff]  }
 0x4a5   : > { %2539 = vmatprep.subr.bf16.mxu1 %v3075_v18  ;;  %v2737_v34 = vld [vmem:[#allocation11 + $0x68] ss:$16 sps:$4 sm:$0xff]  }
 0x4a6   : > { %v2500_v36 = vpop.f32.mrf.mxu1  ;;  %v1069_v37 = vpop.f32.mrf.mxu0 }
 0x4a7   : > { %v1123_v38 = vpack.c.bf16 %v1069_v37, %v1069_v37  ;;  %v2745_v36 = vld [vmem:[#allocation11 + $0x4c] ss:$16 sps:$4 sm:$0xff]   ;;  %v2740_v37 = vld [vmem:[#allocation11 + $0x40] ss:$16 sps:$4 sm:$0xff]  }
 0x4a8   : > { %v2505_v39 = vpop.f32.mrf.mxu0  ;;  %v1115_v40 = vpop.f32.mrf.mxu1  ;;  %2540 = vmatpush3.bf16.msra.mxu1 %v2709_v35  ;;  %v2742_v35 = vld [vmem:[#allocation11 + $0x44] ss:$16 sps:$4 sm:$0xff]  }
 0x4a9   : > { %v1124_v41 = vpack.c.bf16 %v1115_v40, %v1115_v40  ;;  %2534 = vmatmul.mubr.msk.bf16.vlgmr.msra.gmra.mxu0 %vm702_vm2, %v1123_v38  ;;  %1657 = vmatprep.subr.bf16.mxu1 %v2715_v10  ;;  %v2743_v38 = vld [vmem:[#allocation11 + $0x48] ss:$16 sps:$4 sm:$0xff]   ;;  %v2748_v39 = vld [vmem:[#allocation11 + $0x24] ss:$16 sps:$4 sm:$0xff]   ;;  %v2751_v40 = vld [vmem:[#allocation11 + $0x2c] ss:$16 sps:$4 sm:$0xff]  }
 0x4aa   : > { %v1072_v42 = vpop.f32.mrf.mxu0  ;;  %v2511_v43 = vpop.f32.mrf.mxu1  ;;  %1648 = vmatprep.mubr.bf16.mxu0 %v3074_v0  ;;  %1617 = vmatpush1.bf16.msra.mxu0 %v2710_v7  ;;  %v2772_v7 = vld [vmem:[#allocation13 + $0x20] sm:$0xff]   ;;  %v2775_v10 = vld [vmem:[#allocation13 + $0xd8] sm:$0xff]  }
 0x4ab   : > { %2542 = vmatmul.mubr.msk.bf16.vlgmr.msra.gmra.mxu1 %vm702_vm2, %v1124_v41  ;;  %1618 = vmatprep.subr.bf16.mxu0 %v2718_v11  ;;  %v2746_v41 = vld [vmem:[#allocation11 + $0x20] ss:$16 sps:$4 sm:$0xff]   ;;  %v2749_v42 = vld [vmem:[#allocation11 + $0x28] ss:$16 sps:$4 sm:$0xff]   ;;  %v2754_v43 = vld [vmem:[#allocation11 + $0x4] ss:$16 sps:$4 sm:$0xff]  }
 0x4ac   : > { %v2506_v44 = vpop.f32.mrf.mxu0  ;;  %v1118_v45 = vpop.f32.mrf.mxu1  ;;  %1689 = vmatprep.mubr.bf16.mxu1 %v3074_v0  ;;  %1658 = vmatpush1.bf16.msra.mxu1 %v2713_v9  ;;  %v2774_v9 = vld [vmem:[#allocation13 + $0x58] sm:$0xff]  }
 0x4ad   : > { %1659 = vmatprep.subr.bf16.mxu1 %v2721_v12  ;;  %v2757_v44 = vld [vmem:[#allocation11 + $0xc] ss:$16 sps:$4 sm:$0xff]   ;;  %v2752_v45 = vld [vmem:[#allocation11] ss:$16 sps:$4 sm:$0xff]  }
 0x4ae   : > { %v2512_v18 = vpop.f32.mrf.mxu1  ;;  %1619 = vmatpush1.bf16.msra.mxu0 %v2716_v13  ;;  %v2776_v11 = vld [vmem:[#allocation13 + $0x18] sm:$0xff]   ;;  %v2778_v13 = vld [vmem:[#allocation13 + $0x50] sm:$0xff]  }
 0x4af   : > { %1620 = vmatprep.subr.bf16.mxu0 %v2724_v20  ;;  %v2755_v18 = vld [vmem:[#allocation11 + $0x8] ss:$16 sps:$4 sm:$0xff]  }
 0x4b0   : > { %1660 = vmatpush1.bf16.msra.mxu1 %v2719_v14  ;;  %v2777_v12 = vld [vmem:[#allocation13 + $0x98] sm:$0xff]   ;;  %v2779_v14 = vld [vmem:[#allocation13 + $0xd0] sm:$0xff]   ;;  %v2784_v20 = vld [vmem:[#allocation13 + $0x8] sm:$0xff]  }
 0x4b1   : > { %1661 = vmatprep.subr.bf16.mxu1 %v2727_v21  ;;  %v2785_v21 = vld [vmem:[#allocation13 + $0x88] sm:$0xff]  }
 0x4b2   : > { %1621 = vmatpush1.bf16.msra.mxu0 %v2722_v22  ;;  %v2786_v22 = vld [vmem:[#allocation13 + $0x40] sm:$0xff]  }
 0x4b3   : > { %1622 = vmatprep.subr.bf16.mxu0 %v2730_v25  ;;  %v2789_v25 = vld [vmem:[#allocation13 + $0x80] sm:$0xff]  }
 0x4b4   : > { %1662 = vmatpush1.bf16.msra.mxu1 %v2725_v23  ;;  %v2787_v23 = vld [vmem:[#allocation13 + $0xc0] sm:$0xff]  }
 0x4b5   : > { %1663 = vmatprep.subr.bf16.mxu1 %v2733_v27  ;;  %v1450_v27 = vsub.s32 3, %v3303_v28 }
 0x4b6   : > { %1623 = vmatpush1.bf16.msra.mxu0 %v2728_v24  ;;  %v2788_v24 = vld [vmem:[#allocation13] sm:$0xff]  }
 0x4b7   : > { %1624 = vmatprep.subr.bf16.mxu0 %v2736_v30 }
 0x4b8   : > { %1664 = vmatpush1.bf16.msra.mxu1 %v2731_v26  ;;  %v357_v26 = vld [vmem:[#allocation14 + $0x6] sm:$0xf] }
 0x4b9   : > { %1665 = vmatprep.subr.bf16.mxu1 %v2739_v32  ;;  %v1439_v30 = vrot.slane %v357_v26, %v401_v29  ;;  %v1447_v32 = vrot.slane %v357_v26, %v409_v46 }
 0x4ba   : > { %1625 = vmatpush1.bf16.msra.mxu0 %v2734_v33  ;;  %v1443_v33 = vrot.slane %v357_v26, %v405_v31 }
 0x4bb   : > { %1626 = vmatprep.subr.bf16.mxu0 %v2742_v35 }
 0x4bc   : > { %1666 = vmatpush1.bf16.msra.mxu1 %v2737_v34  ;;  %v1451_v34 = vrot.slane %v357_v26, %v1450_v27 }
 0x4bd   : > { %1667 = vmatprep.subr.bf16.mxu1 %v2745_v36 }
 0x4be   : > { %1627 = vmatpush1.bf16.msra.mxu0 %v2740_v37 }
 0x4bf   : > { %1628 = vmatprep.subr.bf16.mxu0 %v2748_v39 }
 0x4c0   : > { %1668 = vmatpush1.bf16.msra.mxu1 %v2743_v38 }
 0x4c1   : > { %1669 = vmatprep.subr.bf16.mxu1 %v2751_v40 }
 0x4c2   : > { %1629 = vmatpush1.bf16.msra.mxu0 %v2746_v41 }
 0x4c3   : > { %1630 = vmatprep.subr.bf16.mxu0 %v2754_v43 }
 0x4c4   : > { %1670 = vmatpush1.bf16.msra.mxu1 %v2749_v42 }
 0x4c5   : > { %1671 = vmatprep.subr.bf16.mxu1 %v2757_v44 }
 0x4c6   : > { %1631 = vmatpush1.bf16.msra.mxu0 %v2752_v45 }
 0x4c8   : > { %1672 = vmatpush1.bf16.msra.mxu1 %v2755_v18 }
 0x4fb   : > { %v1190_v47 = vpop.f32.mrf.mxu0 }
 0x4fd   : > { %v2519_v48 = vpop.f32.mrf.mxu0 }
 0x4fe   : > { %v2759_v48 = vld [vmem:[#allocation13 + $0xf8] sm:$0xff]  }
 0x4ff   : > { %v1193_v49 = vpop.f32.mrf.mxu0  ;;  %2423 = vmatprep.subr.bf16.mxu1 %v2759_v48 }
 0x501   : > { %v2520_v50 = vpop.f32.mrf.mxu0 }
 0x563   : > { %v1245_v51 = vpop.f32.mrf.mxu1 }
 0x564   : > { %v1361_v55 = vadd.f32 %v1245_v51, %v1190_v47  ;;  %v2758_v47 = vld [vmem:[#allocation13 + $0x78] sm:$0xff]  }
 0x565   : > { %v2527_v52 = vpop.f32.mrf.mxu1  ;;  %2401 = vmatprep.subr.bf16.mxu0 %v2758_v47 }
 0x567   : > { %v1248_v54 = vpop.f32.mrf.mxu1 }
 0x568   : > { %v2288_v54 = vld [vmem:[#allocation14 + $0x4] ss:$0 sm:$0xff] }
 0x569   : > { %v2528_v56 = vpop.f32.mrf.mxu1  ;;  %v1300_v57 = vpop.f32.mrf.mxu0 }
 0x56a   : > { %v1362_v59 = vadd.f32 %v1361_v55, %v1300_v57  ;;  %v2289_v56 = vld [vmem:[#allocation14 + $0x5] ss:$0 sm:$0xff] }
 0x56b   : > { %v2535_v60 = vpop.f32.mrf.mxu0  ;;  %v1355_v62 = vpop.f32.mrf.mxu1 }
 0x56c   : > { %v1363_v63 = vadd.f32 %v1362_v59, %v1355_v62  ;;  %v2760_v59 = vld [vmem:[#allocation13 + $0x38] sm:$0xff]   ;;  %v2762_v62 = vld [vmem:[#allocation13 + $0x70] sm:$0xff]  }
 0x56d   : > { %v1303_v53 = vpop.f32.mrf.mxu0  ;;  %v2543_v0 = vpop.f32.mrf.mxu1  ;;  %v2761_v60 = vld [vmem:[#allocation13 + $0xb8] sm:$0xff]  }
 0x56e   : > { %v1370_v2 = vadd.f32 %v2287_v61, %v1363_v63  ;;  %v2763_v63 = vld [vmem:[#allocation13 + $0xf0] sm:$0xff]   ;;  %v2766_v0 = vld [vmem:[#allocation13 + $0x68] sm:$0xff]  }
 0x56f   : > { %v2536_v3 = vpop.f32.mrf.mxu0  ;;  %v1358_v4 = vpop.f32.mrf.mxu1  ;;  %v2765_v53 = vld [vmem:[#allocation13 + $0xb0] sm:$0xff]  }
 0x570   : > { %v1375_v5 = vadd.f32 %v1374_v1, %v1370_v2  ;;  %v2764_v1 = vld [vmem:[#allocation13 + $0x30] sm:$0xff]   ;;  %v2767_v2 = vld [vmem:[#allocation13 + $0xe8] sm:$0xff]  }
 0x571   : > { %v2544_v6 = vpop.f32.mrf.mxu1  ;;  %v2768_v3 = vld [vmem:[#allocation13 + $0x28] sm:$0xff]  }
 0x572   : > { %1376 = vadd.xlane.f32.xlu1 %v1375_v5  ;;  %v2769_v4 = vld [vmem:[#allocation13 + $0xa8] sm:$0xff]   ;;  %v2771_v6 = vld [vmem:[#allocation13 + $0xe0] sm:$0xff]  }
 0x5fb   : > { %v1377_v15 = vpop.xlane.xlu1 %1376 }
 0x5fc   : > { %v1379_v16 = vmul.f32 0.0078125, %v1377_v15  ;;  %v2780_v15 = vld [vmem:[#allocation13 + $0x10] sm:$0xff]  }
 0x5fe   : > { %v1380_v17 = vsub.f32 %v1375_v5, %v1379_v16  ;;  %v2770_v5 = vld [vmem:[#allocation13 + $0x60] sm:$0xff]   ;;  %v2781_v16 = vld [vmem:[#allocation13 + $0x90] sm:$0xff]  }
 0x600   : > { %v1381_v19 = vmul.f32 %v1380_v17, %v1380_v17 }
 0x602   : > { %1382 = vadd.xlane.f32.xlu0 %v1381_v19  ;;  %v2783_v19 = vld [vmem:[#allocation13 + $0xc8] sm:$0xff]  }
 0x68b   : > { %v1383_v49 = vpop.xlane.xlu0 %1382 }
 0x68c   : > { %v1384_v50 = vmul.f32 0.0078125, %v1383_v49 }
 0x68e   : > { %v1385_v51 = vadd.f32 1e-05, %v1384_v50 }
 0x690   : > { %2806 = vrsqrt.f32 %v1385_v51 }
 0x69d   : > { %v2807_v52 = vpop.eup %2806 }
 0x69e   : > { %v1387_v55 = vmul.f32 %v2807_v52, %v1380_v17  ;;  %v2782_v17 = vld [vmem:[#allocation13 + $0x48] sm:$0xff]  }
 0x6a0   : > { %v1394_v57 = vmul.f32 %v2288_v54, %v1387_v55  ;;  %v2322_v54 = vld [vmem:[#allocation14 + $0xa] ss:$0 sm:$0xff] }
 0x6a2   : > { %v3406_v58 = vadd.f32 %v2289_v56, %v1394_v57 }
 0x6a4   : > { %v1402_v61 = vpack.c.bf16 %v3406_v58, %v3406_v58 }
 0x6a6   : > { %1649 = vmatmul.mubr.bf16.vlgmr.msra.gmra.mxu0 %v1402_v61  ;;  %1690 = vmatmul.mubr.bf16.vlgmr.msra.gmra.mxu1 %v1402_v61 }
 0x6a7   : > { %2402 = vmatpush3.bf16.msra.mxu0 %v2760_v59  ;;  %2424 = vmatpush3.bf16.msra.mxu1 %v2761_v60 }
 0x6a8   : > { %2403 = vmatprep.subr.bf16.mxu0 %v2762_v62  ;;  %2425 = vmatprep.subr.bf16.mxu1 %v2763_v63 }
 0x6ab   : > { %2404 = vmatpush3.bf16.msra.mxu0 %v2764_v1  ;;  %2426 = vmatpush3.bf16.msra.mxu1 %v2765_v53 }
 0x6ac   : > { %2405 = vmatprep.subr.bf16.mxu0 %v2766_v0  ;;  %2427 = vmatprep.subr.bf16.mxu1 %v2767_v2 }
 0x6af   : > { %2406 = vmatpush3.bf16.msra.mxu0 %v2768_v3  ;;  %2428 = vmatpush3.bf16.msra.mxu1 %v2769_v4 }
 0x6b0   : > { %2407 = vmatprep.subr.bf16.mxu0 %v2770_v5  ;;  %2429 = vmatprep.subr.bf16.mxu1 %v2771_v6 }
 0x6b3   : > { %2408 = vmatpush3.bf16.msra.mxu0 %v2772_v7  ;;  %2430 = vmatpush3.bf16.msra.mxu1 %v2773_v8 }
 0x6b4   : > { %2409 = vmatprep.subr.bf16.mxu0 %v2774_v9  ;;  %2431 = vmatprep.subr.bf16.mxu1 %v2775_v10  ;;  %v2355_v10 = vld [vmem:[#allocation14 + $0xb] ss:$0 sm:$0xff] }
 0x6b7   : > { %2410 = vmatpush3.bf16.msra.mxu0 %v2776_v11  ;;  %2432 = vmatpush3.bf16.msra.mxu1 %v2777_v12  ;;  %v2356_v12 = vld [vmem:[#allocation14 + $0xc] ss:$0 sm:$0xff] }
 0x6b8   : > { %2411 = vmatprep.subr.bf16.mxu0 %v2778_v13  ;;  %2433 = vmatprep.subr.bf16.mxu1 %v2779_v14 }
 0x6bb   : > { %2412 = vmatpush3.bf16.msra.mxu0 %v2780_v15  ;;  %2434 = vmatpush3.bf16.msra.mxu1 %v2781_v16 }
 0x6bc   : > { %2413 = vmatprep.subr.bf16.mxu0 %v2782_v17  ;;  %2435 = vmatprep.subr.bf16.mxu1 %v2783_v19 }
 0x6bf   : > { %2414 = vmatpush3.bf16.msra.mxu0 %v2784_v20  ;;  %2436 = vmatpush3.bf16.msra.mxu1 %v2785_v21 }
 0x6c0   : > { %2415 = vmatprep.subr.bf16.mxu0 %v2786_v22  ;;  %2437 = vmatprep.subr.bf16.mxu1 %v2787_v23 }
 0x6c3   : > { %2416 = vmatpush3.bf16.msra.mxu0 %v2788_v24  ;;  %2438 = vmatpush3.bf16.msra.mxu1 %v2789_v25 }
 0x766   : > { %v1650_v35 = vpop.f32.mrf.mxu0  ;;  %v1691_v36 = vpop.f32.mrf.mxu1 }
 0x767   : > { %v1651_v37 = vadd.f32 %v1650_v35, %v1439_v30  ;;  %v1692_v38 = vadd.f32 %v1691_v36, %v1447_v32 }
 0x768   : > { %v1652_v39 = vpop.f32.mrf.mxu0  ;;  %v1693_v40 = vpop.f32.mrf.mxu1 }
 0x769   : > { %v1653_v41 = vadd.f32 %v1652_v39, %v1443_v33  ;;  %v1694_v42 = vadd.f32 %v1693_v40, %v1451_v34  ;;  %v1698_v43 = vmax.f32 %v1651_v37, 0.0  ;;  %v1700_v44 = vmax.f32 %v1692_v38, 0.0 }
 0x76a   : > { %v1654_v45 = vpop.f32.mrf.mxu0  ;;  %v1695_v18 = vpop.f32.mrf.mxu1 }
 0x76b   : > { %v1699_v29 = vmax.f32 %v1653_v41, 0.0  ;;  %v1701_v47 = vmax.f32 %v1694_v42, 0.0  ;;  %v1702_v31 = vpack.c.bf16 %v1698_v43, %v1698_v43  ;;  %v1704_v50 = vpack.c.bf16 %v1700_v44, %v1700_v44 }
 0x76c   : > { %v1655_v48 = vpop.f32.mrf.mxu0  ;;  %v1696_v46 = vpop.f32.mrf.mxu1 }
 0x76d   : > { %v1703_v49 = vpack.c.bf16 %v1699_v29, %v1699_v29  ;;  %v1705_v28 = vpack.c.bf16 %v1701_v47, %v1701_v47 }
 0x76f   : > { %2000 = vmatprep.mubr.bf16.mxu0 %v1703_v49  ;;  %2040 = vmatprep.mubr.bf16.mxu1 %v1705_v28 }
 0x770   : > { %2001 = vmatmul.mubr.bf16.vlgmr.msra.gmra.mxu0 %v1702_v31  ;;  %2041 = vmatmul.mubr.bf16.vlgmr.msra.gmra.mxu1 %v1704_v50 }
 0x830   : > { %v2417_v51 = vpop.f32.mrf.mxu0  ;;  %v2439_v52 = vpop.f32.mrf.mxu1 }
 0x832   : > { %v2418_v55 = vpop.f32.mrf.mxu0  ;;  %v2440_v56 = vpop.f32.mrf.mxu1 }
 0x833   : > { %v2419_v57 = vadd.f32 %v2418_v55, %v2417_v51  ;;  %v2441_v62 = vadd.f32 %v2440_v56, %v2439_v52 }
 0x834   : > { %v2420_v59 = vpop.f32.mrf.mxu0  ;;  %v2442_v60 = vpop.f32.mrf.mxu1 }
 0x835   : > { %v2003_v61 = vadd.f32 %v2419_v57, %v2322_v54 }
 0x836   : > { %v2421_v63 = vpop.f32.mrf.mxu0  ;;  %v2443_v1 = vpop.f32.mrf.mxu1 }
 0x837   : > { %v2043_v53 = vadd.f32 %v2441_v62, %v2003_v61 }
 0x839   : > { %v2048_v0 = vadd.f32 %v2043_v53, %v3406_v58 }
 0x83b   : > { %2049 = vadd.xlane.f32.xlu0 %v2048_v0 }
 0x8c4   : > { %v2050_v2 = vpop.xlane.xlu0 %2049 }
 0x8c5   : > { %v2051_v3 = vmul.f32 0.0078125, %v2050_v2 }
 0x8c7   : > { %v2052_v4 = vsub.f32 %v2048_v0, %v2051_v3 }
 0x8c9   : > { %v2053_v5 = vmul.f32 %v2052_v4, %v2052_v4 }
 0x8cb   : > { %2054 = vadd.xlane.f32.xlu1 %v2053_v5 }
 0x954   : > { %v2055_v6 = vpop.xlane.xlu1 %2054 }
 0x955   : > { %v2056_v7 = vmul.f32 0.0078125, %v2055_v6 }
 0x957   : > { %v2057_v8 = vadd.f32 1e-05, %v2056_v7 }
 0x959   : > { %2808 = vrsqrt.f32 %v2057_v8 }
 0x966   : > { %v2809_v9 = vpop.eup %2808 }
 0x967   : > { %v2059_v11 = vmul.f32 %v2809_v9, %v2052_v4 }
 0x969   : > { %v2066_v58 = vmul.f32 %v2355_v10, %v2059_v11 }
 0x96b   : > { %v2073_v13 = vadd.f32 %v2356_v12, %v2066_v58 }
 0x96d   : > { %2074 = vst [vmem:[%s351_s12] sm:$0xff] %v2073_v13 }
 0x96e   : > { %2981 = shalt.err (!%p2978_p9)
}
 0x96f   : > { %s2982_s30 = scalar_lea.hbm %s2088_s11, 128  ;;  %s2986_s1 = scalar_lea.hbm %s3465_s6, 256 }
 0x970   : > { %p2983_p10 = scmp.ne.s32.totalorder %s2088_s11, %s2982_s30  ;;  %p2987_p3 = scmp.lt.s32.totalorder %s2088_s11, %s3465_s6 }
 0x971   : > { %p2988_p0 = scmp.lt.s32.totalorder %s2986_s1, %s2982_s30 }
 0x972   : > { %p2984_p12 = pnand %p2983_p10, %p3233_p2 }
 0x973   : > { %p2989_p13 = por %p2988_p0, %p2987_p3 }
 0x974   : > { %p2985_p5 = pneg %p2984_p12 }
 0x976   : > { %p2990_p1 = pnand %p2989_p13, %p2985_p5 }
 0x978   : > { %2993 = shalt.err (!%p2990_p1)
}
 0x979   : > { %2567 = dma.vmem_to_hbm [thread:$0]  (%p3233_p2), %s2091_s15, 128, %s2088_s11, %s2076_s17  }
 0x97a PF: > { %s2102_s29 = sand.u32 1, %s3040_s21   ;;  %p3483_p6 = scmp.ne.s32.totalorder %s3480_s20, 0 }
 0x97b   : > { %p3484_p4 = scmp.ge.s32.totalorder %s3060_s26, 2  ;;  %s2103_s16 = scalar_lea.sflag [#allocation7], %s2102_s29 }
 0x97d   : > { %p2590_p8 = pnand %p3484_p4, %p3483_p6 }
 0x97f   : > { %p2591_p11 = pneg %p2590_p8 }
 0x981   : > { %3035 = dma.done.wait (%p2591_p11), %s2103_s16, 128  }
 0x982   : > { %3037 = vsyncadd (%p2591_p11), %s2103_s16, 4294967168  ;;  %s25_s26 = sadd.s32 1, %s3060_s26   ;;  %s3485_s21 = smov %s3044_s22 }
 0x983   : > { %p22_p7 = scmp.ge.s32.totalorder %s25_s26, 4   ;;  %s3486_s22 = smov %s3048_s23 }
 0x984   : > { %s3487_s23 = smov %s3239_s19  ;;  %s3488_s24 = smov %s3056_s25 }
 0x985   : > { %s3489_s25 = smov %s3491_s13  ;;  %24 = sbr.rel (!%p22_p7) target bundleno = 13 (0xd), region = 124 }
 0x98a   :  { %2108 = vsyncpa [#allocation6], 1 }
 0x98b   :  { %2110 = vsyncpa [#allocation6 + $0x1], 1 }
 0x98c   :  { %2111 = vsyncpa [#allocation9], 1 }
 0x98d   :  { %2112 = vsyncpa [#allocation12], 1 }
 0x98e   :  { %2113 = vsyncpa [#allocation15], 1 }
 0x98f   :  { %2114 = vsyncpa [#allocation7], 1 }
 0x990   :  { %2116 = vsyncpa [#allocation7 + $0x1], 1 }

</bundles_post_ra>
